<compile_context>
chip_gen: v5e
topology: v5e:2x2
jax: 0.10.0
libtpu: 0.0.40
codegen_flags: <defaults>
</compile_context>

<pallas_src>
import math

import jax
import jax.numpy as jnp
from jax.experimental import pallas as pl
from jax.experimental.pallas import tpu as pltpu

# ----------------------- synthetic model config -----------------------------
BATCH = 2
SEQ = 8
HIDDEN = 32
NUM_HEADS = 4
HEAD_DIM = HIDDEN // NUM_HEADS
INTERMEDIATE = 64
NUM_LAYERS = 2
NUM_LABELS = 3
VOCAB = 64
MAX_POS = 40
PAD_ID = 1                  # Camembert / Roberta padding idx
LAYER_NORM_EPS = 1e-5       # RobertaConfig default
CLS_PAD = 128               # lane-dense padding for the classifier output
TOKENS = BATCH * SEQ


# ----------------------------- kernel helpers --------------------------------
def _ln(x, g, b):
    """LayerNorm over the last axis (f32 stats)."""
    mean = jnp.mean(x, axis=-1, keepdims=True)
    var = jnp.mean((x - mean) ** 2, axis=-1, keepdims=True)
    return (x - mean) * jax.lax.rsqrt(var + LAYER_NORM_EPS) * g + b


def _erf(x):
    """Abramowitz & Stegun 7.1.26 erf approximation (|err| < 1.5e-7).

    Built only from ops with guaranteed Mosaic lowerings (exp/abs/where/div),
    so exact-GELU semantics are kept without relying on a lax.erf lowering.
    """
    a1, a2, a3, a4, a5 = 0.254829592, -0.284496736, 1.421413741, -1.453152027, 1.061405429
    p = 0.3275911
    ax = jnp.abs(x)
    t = 1.0 / (1.0 + p * ax)
    poly = ((((a5 * t + a4) * t + a3) * t + a2) * t + a1) * t
    y = 1.0 - poly * jnp.exp(-ax * ax)
    return jnp.where(x >= 0.0, y, -y)


def _gelu(x):
    """Exact (erf-based) GELU, matching torch.nn.GELU / HF hidden_act='gelu'."""
    return 0.5 * x * (1.0 + _erf(x * 0.7071067811865476))


# --------------------------- fused forward kernel -----------------------------
def _forward_kernel(emb_ref, bias_ref,
                    embg_ref, embb_ref,
                    wqkv_ref, bqkv_ref, wo_ref, bo_ref,
                    ln1g_ref, ln1b_ref,
                    wi_ref, bi_ref, wf_ref, bf_ref,
                    ln2g_ref, ln2b_ref,
                    clsw_ref, clsb_ref,
                    logits_ref):
    """Whole forward (embed-LN -> NUM_LAYERS encoder layers -> classifier)."""
    # Embedding LayerNorm over all B*S token rows at once (LN is per-row).
    hidden = _ln(emb_ref[...], embg_ref[...], embb_ref[...])          # (B*S, H)

    for l in range(NUM_LAYERS):
        # ---- fused QKV projection: one lane-dense (16,32)x(32,96) MXU push.
        # (1/sqrt(head_dim) is folded into Wq/bq at parameter-prep time.)
        qkv = (jnp.dot(hidden, wqkv_ref[l], preferred_element_type=jnp.float32)
               + bqkv_ref[l])                                         # (B*S, 3H)

        ctx_rows = []
        for b in range(BATCH):                                        # B = 2, unrolled
            qkv_b = qkv[b * SEQ:(b + 1) * SEQ, :]                     # (S, 3H)
            # Split into per-head (NH, S, Dh) stacks (heads become the batch
            # dim of the score / context dot_generals).
            q = jnp.stack([qkv_b[:, h * HEAD_DIM:(h + 1) * HEAD_DIM]
                           for h in range(NUM_HEADS)], axis=0)
            k = jnp.stack([qkv_b[:, HIDDEN + h * HEAD_DIM:HIDDEN + (h + 1) * HEAD_DIM]
                           for h in range(NUM_HEADS)], axis=0)
            v = jnp.stack([qkv_b[:, 2 * HIDDEN + h * HEAD_DIM:2 * HIDDEN + (h + 1) * HEAD_DIM]
                           for h in range(NUM_HEADS)], axis=0)

            scores = jnp.einsum('hqd,hkd->hqk', q, k,
                                preferred_element_type=jnp.float32)    # (NH, S, S)
            scores = scores + bias_ref[b][None, :, :]                  # key-mask bias

            # Numerically-stable softmax; divide moved to the EUP via reciprocal.
            m = jnp.max(scores, axis=-1, keepdims=True)
            e = jnp.exp(scores - m)
            s = jnp.sum(e, axis=-1, keepdims=True)
            probs = e * pl.reciprocal(s, approx=True)

            ctx = jnp.einsum('hqk,hkd->hqd', probs, v,
                             preferred_element_type=jnp.float32)       # (NH, S, Dh)
            # Re-concatenate heads along lanes -> (S, H), head-major like HF.
            ctx_rows.append(jnp.concatenate(
                [ctx[h] for h in range(NUM_HEADS)], axis=-1))
        ctx_all = jnp.concatenate(ctx_rows, axis=0)                    # (B*S, H)

        # ---- attention output projection (single matmul) + add & LN 1.
        attn = (jnp.dot(ctx_all, wo_ref[l], preferred_element_type=jnp.float32)
                + bo_ref[l])
        h1 = _ln(attn + hidden, ln1g_ref[l], ln1b_ref[l])

        # ---- feed-forward + add & LN 2.
        inter = (jnp.dot(h1, wi_ref[l], preferred_element_type=jnp.float32)
                 + bi_ref[l])
        inter = _gelu(inter)
        ffn = (jnp.dot(inter, wf_ref[l], preferred_element_type=jnp.float32)
               + bf_ref[l])
        hidden = _ln(ffn + h1, ln2g_ref[l], ln2b_ref[l])

    # ---- custom classifier head fused into the same kernel:
    # pooled_output = last_hidden_state[:, 0, :] -> rows b*SEQ of the flat state.
    # (dropout is identity in eval mode)
    pooled = jnp.concatenate(
        [hidden[b * SEQ:b * SEQ + 1, :] for b in range(BATCH)], axis=0)  # (B, H)
    logits_ref[...] = (jnp.dot(pooled, clsw_ref[...],
                               preferred_element_type=jnp.float32)
                       + clsb_ref[...])                                   # (B, 128)


def fused_forward(emb_flat, mask_bias, p):
    """Single pallas_call for the whole forward. Returns (B, NUM_LABELS) logits."""

    def full(x):
        n = x.ndim
        return pl.BlockSpec(x.shape, lambda i, _n=n: (0,) * _n)

    args = (emb_flat, mask_bias,
            p["emb_ln_g"], p["emb_ln_b"],
            p["wqkv"], p["bqkv"], p["wo"], p["bo"],
            p["ln1_g"], p["ln1_b"],
            p["wi"], p["bi"], p["wf"], p["bf"],
            p["ln2_g"], p["ln2_b"],
            p["cls_w_pad"], p["cls_b_pad"])

    logits_pad = pl.pallas_call(
        _forward_kernel,
        out_shape=jax.ShapeDtypeStruct((BATCH, CLS_PAD), jnp.float32),
        grid=(1,),                                   # single step; no batch grid
        in_specs=[full(a) for a in args],
        out_specs=pl.BlockSpec((BATCH, CLS_PAD), lambda i: (0, 0)),
        compiler_params=pltpu.CompilerParams(
            # Per review: do not force megacore partitioning at this size.
            dimension_semantics=("arbitrary",)),
    )(*args)
    return logits_pad[:, :NUM_LABELS]


# --------------------------- parameter init ----------------------------------
def init_params(key):
    def nrm(k, shape, scale=0.02):
        return (scale * jax.random.normal(k, shape)).astype(jnp.float32)

    keys = iter(jax.random.split(key, 8 + NUM_LAYERS * 8 + 2))
    params = {
        "word_emb": nrm(next(keys), (VOCAB, HIDDEN)),
        "pos_emb": nrm(next(keys), (MAX_POS, HIDDEN)),
        "type_emb": nrm(next(keys), (1, HIDDEN)),
        "emb_ln_g": jnp.ones((HIDDEN,), jnp.float32),
        "emb_ln_b": jnp.zeros((HIDDEN,), jnp.float32),
        "layers": [],
        "cls_w": nrm(next(keys), (HIDDEN, NUM_LABELS)),
        "cls_b": jnp.zeros((NUM_LABELS,), jnp.float32),
    }
    for _ in range(NUM_LAYERS):
        layer = {
            "wq": nrm(next(keys), (HIDDEN, HIDDEN)), "bq": jnp.zeros((HIDDEN,), jnp.float32),
            "wk": nrm(next(keys), (HIDDEN, HIDDEN)), "bk": jnp.zeros((HIDDEN,), jnp.float32),
            "wv": nrm(next(keys), (HIDDEN, HIDDEN)), "bv": jnp.zeros((HIDDEN,), jnp.float32),
            "wo": nrm(next(keys), (HIDDEN, HIDDEN)), "bo": jnp.zeros((HIDDEN,), jnp.float32),
            "ln1_g": jnp.ones((HIDDEN,), jnp.float32), "ln1_b": jnp.zeros((HIDDEN,), jnp.float32),
            "wi": nrm(next(keys), (HIDDEN, INTERMEDIATE)), "bi": jnp.zeros((INTERMEDIATE,), jnp.float32),
            "wf": nrm(next(keys), (INTERMEDIATE, HIDDEN)), "bf": jnp.zeros((HIDDEN,), jnp.float32),
            "ln2_g": jnp.ones((HIDDEN,), jnp.float32), "ln2_b": jnp.zeros((HIDDEN,), jnp.float32),
        }
        params["layers"].append(layer)
    return params


def prepare_params(raw):
    """Fold 1/sqrt(Dh) into Q, fuse QKV into (H,3H), stack layers along a
    leading NUM_LAYERS axis, pad the classifier to 128 lanes."""
    # TODO(synk): real module loads pretrained torch weights (out,in layout);
    # they must be transposed to (in,out) before this packing step.
    scale = 1.0 / math.sqrt(HEAD_DIM)

    wqkv, bqkv, wo, bo = [], [], [], []
    ln1g, ln1b, wi, bi, wf, bf, ln2g, ln2b = [], [], [], [], [], [], [], []
    for l in raw["layers"]:
        wqkv.append(jnp.concatenate([l["wq"] * scale, l["wk"], l["wv"]], axis=1))
        bqkv.append(jnp.concatenate([l["bq"] * scale, l["bk"], l["bv"]]).reshape(1, 3 * HIDDEN))
        wo.append(l["wo"])
        bo.append(l["bo"].reshape(1, HIDDEN))
        ln1g.append(l["ln1_g"].reshape(1, HIDDEN))
        ln1b.append(l["ln1_b"].reshape(1, HIDDEN))
        wi.append(l["wi"])
        bi.append(l["bi"].reshape(1, INTERMEDIATE))
        wf.append(l["wf"])
        bf.append(l["bf"].reshape(1, HIDDEN))
        ln2g.append(l["ln2_g"].reshape(1, HIDDEN))
        ln2b.append(l["ln2_b"].reshape(1, HIDDEN))

    cls_w_pad = jnp.zeros((HIDDEN, CLS_PAD), jnp.float32).at[:, :NUM_LABELS].set(raw["cls_w"])
    cls_b_pad = jnp.zeros((1, CLS_PAD), jnp.float32).at[0, :NUM_LABELS].set(raw["cls_b"])

    return {
        "word_emb": raw["word_emb"],
        "pos_emb": raw["pos_emb"],
        "type_emb": raw["type_emb"],
        "emb_ln_g": raw["emb_ln_g"].reshape(1, HIDDEN),
        "emb_ln_b": raw["emb_ln_b"].reshape(1, HIDDEN),
        "wqkv": jnp.stack(wqkv), "bqkv": jnp.stack(bqkv),
        "wo": jnp.stack(wo), "bo": jnp.stack(bo),
        "ln1_g": jnp.stack(ln1g), "ln1_b": jnp.stack(ln1b),
        "wi": jnp.stack(wi), "bi": jnp.stack(bi),
        "wf": jnp.stack(wf), "bf": jnp.stack(bf),
        "ln2_g": jnp.stack(ln2g), "ln2_b": jnp.stack(ln2b),
        "cls_w_pad": cls_w_pad, "cls_b_pad": cls_b_pad,
    }


# ------------------------------ forward pass ----------------------------------
def forward(params, input_ids, attention_mask, labels=None):
    B, S = input_ids.shape
    mask_f = attention_mask.astype(jnp.float32)

    # Roberta-style position ids: cumsum over non-pad tokens, offset by pad_id.
    not_pad = (input_ids != PAD_ID).astype(jnp.int32)
    pos_ids = jnp.cumsum(not_pad, axis=1) * not_pad + PAD_ID

    # Embedding gathers are glue; everything after runs in one Pallas kernel.
    emb = (params["word_emb"][input_ids]
           + params["pos_emb"][pos_ids]
           + params["type_emb"][0][None, None, :])
    emb_flat = emb.reshape(B * S, HIDDEN)

    # Additive attention bias over key positions: 0 attended, -1e9 for pad.
    mask_bias = ((1.0 - mask_f) * -1e9).reshape(B, 1, S)

    logits = fused_forward(emb_flat, mask_bias, params)

    loss = None
    if labels is not None:
        # nn.CrossEntropyLoss (mean reduction) -- scalar glue kept in plain JAX.
        logp = jax.nn.log_softmax(logits, axis=-1)
        loss = -jnp.mean(jnp.take_along_axis(logp, labels[:, None], axis=1))
    return (loss, logits) if loss is not None else (None, logits)


# ---------------------------------- main --------------------------------------
if __name__ == "__main__":
    key = jax.random.PRNGKey(0)
    k_params, k_ids, k_labels = jax.random.split(key, 3)

    # TODO(synk): real module loads pretrained Camembert weights via
    # from_pretrained(); synthetic random weights are used here instead.
    params = prepare_params(init_params(k_params))

    input_ids = jax.random.randint(k_ids, (BATCH, SEQ), 2, VOCAB, dtype=jnp.int32)
    # Pad the tail of the second sequence to exercise the attention mask.
    input_ids = input_ids.at[1, -2:].set(PAD_ID)
    attention_mask = (input_ids != PAD_ID).astype(jnp.int32)
    labels = jax.random.randint(k_labels, (BATCH,), 0, NUM_LABELS, dtype=jnp.int32)

    fwd = jax.jit(forward)
    loss, logits = fwd(params, input_ids, attention_mask, labels)
    jax.block_until_ready((loss, logits))
    assert logits.shape == (BATCH, NUM_LABELS)
    assert bool(jnp.all(jnp.isfinite(logits)))
    assert bool(jnp.isfinite(loss))
    print("KERNEL_OK")
</pallas_src>

<mosaic_0001>
module attributes {stable_mosaic.version = 11 : i64} {
  func.func @_forward_kernel(%arg0: i32, %arg1: memref<16x32xf32, #tpu.memory_space<vmem>>, %arg2: memref<2x1x8xf32, #tpu.memory_space<vmem>>, %arg3: memref<1x32xf32, #tpu.memory_space<vmem>>, %arg4: memref<1x32xf32, #tpu.memory_space<vmem>>, %arg5: memref<2x32x96xf32, #tpu.memory_space<vmem>>, %arg6: memref<2x1x96xf32, #tpu.memory_space<vmem>>, %arg7: memref<2x32x32xf32, #tpu.memory_space<vmem>>, %arg8: memref<2x1x32xf32, #tpu.memory_space<vmem>>, %arg9: memref<2x1x32xf32, #tpu.memory_space<vmem>>, %arg10: memref<2x1x32xf32, #tpu.memory_space<vmem>>, %arg11: memref<2x32x64xf32, #tpu.memory_space<vmem>>, %arg12: memref<2x1x64xf32, #tpu.memory_space<vmem>>, %arg13: memref<2x64x32xf32, #tpu.memory_space<vmem>>, %arg14: memref<2x1x32xf32, #tpu.memory_space<vmem>>, %arg15: memref<2x1x32xf32, #tpu.memory_space<vmem>>, %arg16: memref<2x1x32xf32, #tpu.memory_space<vmem>>, %arg17: memref<32x128xf32, #tpu.memory_space<vmem>>, %arg18: memref<1x128xf32, #tpu.memory_space<vmem>>, %arg19: memref<2x128xf32, #tpu.memory_space<vmem>>) attributes {dimension_semantics = [#tpu.dimension_semantics<arbitrary>], iteration_bounds = array<i64: 1>, scalar_prefetch = 0 : i64, scratch_operands = 0 : i64, tpu.core_type = #tpu.core_type<tc>, window_params = [{pipeline_mode = #tpu.pipeline_mode<synchronous>, transform_indices = @transform_0, window_bounds = array<i64: 16, 32>}, {pipeline_mode = #tpu.pipeline_mode<synchronous>, transform_indices = @transform_1, window_bounds = array<i64: 2, 1, 8>}, {pipeline_mode = #tpu.pipeline_mode<synchronous>, transform_indices = @transform_2, window_bounds = array<i64: 1, 32>}, {pipeline_mode = #tpu.pipeline_mode<synchronous>, transform_indices = @transform_3, window_bounds = array<i64: 1, 32>}, {pipeline_mode = #tpu.pipeline_mode<synchronous>, transform_indices = @transform_4, window_bounds = array<i64: 2, 32, 96>}, {pipeline_mode = #tpu.pipeline_mode<synchronous>, transform_indices = @transform_5, window_bounds = array<i64: 2, 1, 96>}, {pipeline_mode = #tpu.pipeline_mode<synchronous>, transform_indices = @transform_6, window_bounds = array<i64: 2, 32, 32>}, {pipeline_mode = #tpu.pipeline_mode<synchronous>, transform_indices = @transform_7, window_bounds = array<i64: 2, 1, 32>}, {pipeline_mode = #tpu.pipeline_mode<synchronous>, transform_indices = @transform_8, window_bounds = array<i64: 2, 1, 32>}, {pipeline_mode = #tpu.pipeline_mode<synchronous>, transform_indices = @transform_9, window_bounds = array<i64: 2, 1, 32>}, {pipeline_mode = #tpu.pipeline_mode<synchronous>, transform_indices = @transform_10, window_bounds = array<i64: 2, 32, 64>}, {pipeline_mode = #tpu.pipeline_mode<synchronous>, transform_indices = @transform_11, window_bounds = array<i64: 2, 1, 64>}, {pipeline_mode = #tpu.pipeline_mode<synchronous>, transform_indices = @transform_12, window_bounds = array<i64: 2, 64, 32>}, {pipeline_mode = #tpu.pipeline_mode<synchronous>, transform_indices = @transform_13, window_bounds = array<i64: 2, 1, 32>}, {pipeline_mode = #tpu.pipeline_mode<synchronous>, transform_indices = @transform_14, window_bounds = array<i64: 2, 1, 32>}, {pipeline_mode = #tpu.pipeline_mode<synchronous>, transform_indices = @transform_15, window_bounds = array<i64: 2, 1, 32>}, {pipeline_mode = #tpu.pipeline_mode<synchronous>, transform_indices = @transform_16, window_bounds = array<i64: 32, 128>}, {pipeline_mode = #tpu.pipeline_mode<synchronous>, transform_indices = @transform_17, window_bounds = array<i64: 1, 128>}, {pipeline_mode = #tpu.pipeline_mode<synchronous>, transform_indices = @transform_18, window_bounds = array<i64: 2, 128>}]} {
    %c0 = arith.constant 0 : index
    %c0_0 = arith.constant 0 : index
    %0 = vector.load %arg1[%c0, %c0_0] : memref<16x32xf32, #tpu.memory_space<vmem>>, vector<16x32xf32>
    %c0_1 = arith.constant 0 : index
    %c0_2 = arith.constant 0 : index
    %1 = vector.load %arg3[%c0_1, %c0_2] : memref<1x32xf32, #tpu.memory_space<vmem>>, vector<1x32xf32>
    %c0_3 = arith.constant 0 : index
    %c0_4 = arith.constant 0 : index
    %2 = vector.load %arg4[%c0_3, %c0_4] : memref<1x32xf32, #tpu.memory_space<vmem>>, vector<1x32xf32>
    %cst = arith.constant dense<0.000000e+00> : vector<16xf32>
    %3 = vector.multi_reduction <add>, %0, %cst [1] : vector<16x32xf32> to vector<16xf32>
    %4 = vector.shape_cast %3 : vector<16xf32> to vector<16x1xf32>
    %cst_5 = arith.constant 3.200000e+01 : f32
    %5 = vector.broadcast %cst_5 : f32 to vector<16x1xf32>
    %6 = arith.divf %4, %5 : vector<16x1xf32>
    %7 = vector.broadcast %6 : vector<16x1xf32> to vector<16x32xf32>
    %8 = arith.subf %0, %7 : vector<16x32xf32>
    %9 = arith.mulf %8, %8 : vector<16x32xf32>
    %cst_6 = arith.constant dense<0.000000e+00> : vector<16xf32>
    %10 = vector.multi_reduction <add>, %9, %cst_6 [1] : vector<16x32xf32> to vector<16xf32>
    %11 = vector.shape_cast %10 : vector<16xf32> to vector<16x1xf32>
    %cst_7 = arith.constant 3.200000e+01 : f32
    %12 = vector.broadcast %cst_7 : f32 to vector<16x1xf32>
    %13 = arith.divf %11, %12 : vector<16x1xf32>
    %14 = vector.broadcast %6 : vector<16x1xf32> to vector<16x32xf32>
    %15 = arith.subf %0, %14 : vector<16x32xf32>
    %cst_8 = arith.constant 9.99999974E-6 : f32
    %16 = vector.broadcast %cst_8 : f32 to vector<16x1xf32>
    %17 = arith.addf %13, %16 : vector<16x1xf32>
    %18 = math.rsqrt %17 : vector<16x1xf32>
    %19 = vector.broadcast %18 : vector<16x1xf32> to vector<16x32xf32>
    %20 = arith.mulf %15, %19 : vector<16x32xf32>
    %21 = vector.broadcast %1 : vector<1x32xf32> to vector<16x32xf32>
    %22 = arith.mulf %20, %21 : vector<16x32xf32>
    %23 = vector.broadcast %2 : vector<1x32xf32> to vector<16x32xf32>
    %24 = arith.addf %22, %23 : vector<16x32xf32>
    %c0_9 = arith.constant 0 : index
    %c0_10 = arith.constant 0 : index
    %c0_11 = arith.constant 0 : index
    %25 = vector.load %arg5[%c0_9, %c0_10, %c0_11] : memref<2x32x96xf32, #tpu.memory_space<vmem>>, vector<1x32x96xf32>
    %26 = vector.shape_cast %25 : vector<1x32x96xf32> to vector<32x96xf32>
    %cst_12 = arith.constant dense<0.000000e+00> : vector<16x96xf32>
    %27 = tpu.matmul %24, %26, %cst_12 {dimension_numbers = #tpu.dot_dimension_numbers<[1], [0], [0], [1], [0, 0, 1, 1], [], []>} : vector<16x32xf32>, vector<32x96xf32>, vector<16x96xf32> -> vector<16x96xf32>
    %c0_13 = arith.constant 0 : index
    %c0_14 = arith.constant 0 : index
    %c0_15 = arith.constant 0 : index
    %28 = vector.load %arg6[%c0_13, %c0_14, %c0_15] : memref<2x1x96xf32, #tpu.memory_space<vmem>>, vector<1x1x96xf32>
    %29 = vector.shape_cast %28 : vector<1x1x96xf32> to vector<1x96xf32>
    %30 = vector.broadcast %29 : vector<1x96xf32> to vector<16x96xf32>
    %31 = arith.addf %27, %30 : vector<16x96xf32>
    %32 = vector.extract_strided_slice %31 {offsets = [0, 0], sizes = [8, 96], strides = [1, 1]} : vector<16x96xf32> to vector<8x96xf32>
    %33 = vector.extract_strided_slice %32 {offsets = [0, 0], sizes = [8, 8], strides = [1, 1]} : vector<8x96xf32> to vector<8x8xf32>
    %34 = vector.extract_strided_slice %32 {offsets = [0, 8], sizes = [8, 8], strides = [1, 1]} : vector<8x96xf32> to vector<8x8xf32>
    %35 = vector.extract_strided_slice %32 {offsets = [0, 16], sizes = [8, 8], strides = [1, 1]} : vector<8x96xf32> to vector<8x8xf32>
    %36 = vector.extract_strided_slice %32 {offsets = [0, 24], sizes = [8, 8], strides = [1, 1]} : vector<8x96xf32> to vector<8x8xf32>
    %37 = vector.shape_cast %33 : vector<8x8xf32> to vector<1x8x8xf32>
    %38 = vector.shape_cast %34 : vector<8x8xf32> to vector<1x8x8xf32>
    %39 = vector.shape_cast %35 : vector<8x8xf32> to vector<1x8x8xf32>
    %40 = vector.shape_cast %36 : vector<8x8xf32> to vector<1x8x8xf32>
    %41 = tpu.concatenate %37, %38, %39, %40 in 0 : vector<1x8x8xf32>, vector<1x8x8xf32>, vector<1x8x8xf32>, vector<1x8x8xf32> -> vector<4x8x8xf32>
    %42 = vector.extract_strided_slice %32 {offsets = [0, 32], sizes = [8, 8], strides = [1, 1]} : vector<8x96xf32> to vector<8x8xf32>
    %43 = vector.extract_strided_slice %32 {offsets = [0, 40], sizes = [8, 8], strides = [1, 1]} : vector<8x96xf32> to vector<8x8xf32>
    %44 = vector.extract_strided_slice %32 {offsets = [0, 48], sizes = [8, 8], strides = [1, 1]} : vector<8x96xf32> to vector<8x8xf32>
    %45 = vector.extract_strided_slice %32 {offsets = [0, 56], sizes = [8, 8], strides = [1, 1]} : vector<8x96xf32> to vector<8x8xf32>
    %46 = vector.shape_cast %42 : vector<8x8xf32> to vector<1x8x8xf32>
    %47 = vector.shape_cast %43 : vector<8x8xf32> to vector<1x8x8xf32>
    %48 = vector.shape_cast %44 : vector<8x8xf32> to vector<1x8x8xf32>
    %49 = vector.shape_cast %45 : vector<8x8xf32> to vector<1x8x8xf32>
    %50 = tpu.concatenate %46, %47, %48, %49 in 0 : vector<1x8x8xf32>, vector<1x8x8xf32>, vector<1x8x8xf32>, vector<1x8x8xf32> -> vector<4x8x8xf32>
    %51 = vector.extract_strided_slice %32 {offsets = [0, 64], sizes = [8, 8], strides = [1, 1]} : vector<8x96xf32> to vector<8x8xf32>
    %52 = vector.extract_strided_slice %32 {offsets = [0, 72], sizes = [8, 8], strides = [1, 1]} : vector<8x96xf32> to vector<8x8xf32>
    %53 = vector.extract_strided_slice %32 {offsets = [0, 80], sizes = [8, 8], strides = [1, 1]} : vector<8x96xf32> to vector<8x8xf32>
    %54 = vector.extract_strided_slice %32 {offsets = [0, 88], sizes = [8, 8], strides = [1, 1]} : vector<8x96xf32> to vector<8x8xf32>
    %55 = vector.shape_cast %51 : vector<8x8xf32> to vector<1x8x8xf32>
    %56 = vector.shape_cast %52 : vector<8x8xf32> to vector<1x8x8xf32>
    %57 = vector.shape_cast %53 : vector<8x8xf32> to vector<1x8x8xf32>
    %58 = vector.shape_cast %54 : vector<8x8xf32> to vector<1x8x8xf32>
    %59 = tpu.concatenate %55, %56, %57, %58 in 0 : vector<1x8x8xf32>, vector<1x8x8xf32>, vector<1x8x8xf32>, vector<1x8x8xf32> -> vector<4x8x8xf32>
    "tpu.trace_start"() <{level = 10 : i32, message = "hqd,hkd->hqk"}> : () -> ()
    %cst_16 = arith.constant dense<0.000000e+00> : vector<4x8x8xf32>
    %60 = tpu.matmul %41, %50, %cst_16 {dimension_numbers = #tpu.dot_dimension_numbers<[2], [2], [1], [1], [0, 0, 0, 1, 1, 1], [0], [0]>} : vector<4x8x8xf32>, vector<4x8x8xf32>, vector<4x8x8xf32> -> vector<4x8x8xf32>
    "tpu.trace_stop"() : () -> ()
    %c0_17 = arith.constant 0 : index
    %c0_18 = arith.constant 0 : index
    %c0_19 = arith.constant 0 : index
    %61 = vector.load %arg2[%c0_17, %c0_18, %c0_19] : memref<2x1x8xf32, #tpu.memory_space<vmem>>, vector<1x1x8xf32>
    %62 = vector.shape_cast %61 : vector<1x1x8xf32> to vector<1x8xf32>
    %63 = vector.shape_cast %62 : vector<1x8xf32> to vector<1x1x8xf32>
    %64 = vector.broadcast %63 : vector<1x1x8xf32> to vector<4x8x8xf32>
    %65 = arith.addf %60, %64 : vector<4x8x8xf32>
    %cst_20 = arith.constant dense<0xFF800000> : vector<4x8xf32>
    %66 = vector.multi_reduction <maximumf>, %65, %cst_20 [2] : vector<4x8x8xf32> to vector<4x8xf32>
    %67 = vector.shape_cast %66 : vector<4x8xf32> to vector<4x8x1xf32>
    %68 = vector.broadcast %67 : vector<4x8x1xf32> to vector<4x8x8xf32>
    %69 = arith.subf %65, %68 : vector<4x8x8xf32>
    %70 = math.exp %69 : vector<4x8x8xf32>
    %cst_21 = arith.constant dense<0.000000e+00> : vector<4x8xf32>
    %71 = vector.multi_reduction <add>, %70, %cst_21 [2] : vector<4x8x8xf32> to vector<4x8xf32>
    %72 = vector.shape_cast %71 : vector<4x8xf32> to vector<4x8x1xf32>
    %73 = tpu.reciprocal %72 {approx = true} : vector<4x8x1xf32> -> vector<4x8x1xf32>
    %74 = vector.broadcast %73 : vector<4x8x1xf32> to vector<4x8x8xf32>
    %75 = arith.mulf %70, %74 : vector<4x8x8xf32>
    "tpu.trace_start"() <{level = 10 : i32, message = "hqk,hkd->hqd"}> : () -> ()
    %cst_22 = arith.constant dense<0.000000e+00> : vector<4x8x8xf32>
    %76 = tpu.matmul %75, %59, %cst_22 {dimension_numbers = #tpu.dot_dimension_numbers<[2], [1], [1], [2], [0, 0, 0, 1, 1, 2], [0], [0]>} : vector<4x8x8xf32>, vector<4x8x8xf32>, vector<4x8x8xf32> -> vector<4x8x8xf32>
    "tpu.trace_stop"() : () -> ()
    %77 = vector.extract_strided_slice %76 {offsets = [0, 0, 0], sizes = [1, 8, 8], strides = [1, 1, 1]} : vector<4x8x8xf32> to vector<1x8x8xf32>
    %78 = vector.shape_cast %77 : vector<1x8x8xf32> to vector<8x8xf32>
    %79 = vector.extract_strided_slice %76 {offsets = [1, 0, 0], sizes = [1, 8, 8], strides = [1, 1, 1]} : vector<4x8x8xf32> to vector<1x8x8xf32>
    %80 = vector.shape_cast %79 : vector<1x8x8xf32> to vector<8x8xf32>
    %81 = vector.extract_strided_slice %76 {offsets = [2, 0, 0], sizes = [1, 8, 8], strides = [1, 1, 1]} : vector<4x8x8xf32> to vector<1x8x8xf32>
    %82 = vector.shape_cast %81 : vector<1x8x8xf32> to vector<8x8xf32>
    %83 = vector.extract_strided_slice %76 {offsets = [3, 0, 0], sizes = [1, 8, 8], strides = [1, 1, 1]} : vector<4x8x8xf32> to vector<1x8x8xf32>
    %84 = vector.shape_cast %83 : vector<1x8x8xf32> to vector<8x8xf32>
    %85 = tpu.concatenate %78, %80, %82, %84 in 1 : vector<8x8xf32>, vector<8x8xf32>, vector<8x8xf32>, vector<8x8xf32> -> vector<8x32xf32>
    %86 = vector.extract_strided_slice %31 {offsets = [8, 0], sizes = [8, 96], strides = [1, 1]} : vector<16x96xf32> to vector<8x96xf32>
    %87 = vector.extract_strided_slice %86 {offsets = [0, 0], sizes = [8, 8], strides = [1, 1]} : vector<8x96xf32> to vector<8x8xf32>
    %88 = vector.extract_strided_slice %86 {offsets = [0, 8], sizes = [8, 8], strides = [1, 1]} : vector<8x96xf32> to vector<8x8xf32>
    %89 = vector.extract_strided_slice %86 {offsets = [0, 16], sizes = [8, 8], strides = [1, 1]} : vector<8x96xf32> to vector<8x8xf32>
    %90 = vector.extract_strided_slice %86 {offsets = [0, 24], sizes = [8, 8], strides = [1, 1]} : vector<8x96xf32> to vector<8x8xf32>
    %91 = vector.shape_cast %87 : vector<8x8xf32> to vector<1x8x8xf32>
    %92 = vector.shape_cast %88 : vector<8x8xf32> to vector<1x8x8xf32>
    %93 = vector.shape_cast %89 : vector<8x8xf32> to vector<1x8x8xf32>
    %94 = vector.shape_cast %90 : vector<8x8xf32> to vector<1x8x8xf32>
    %95 = tpu.concatenate %91, %92, %93, %94 in 0 : vector<1x8x8xf32>, vector<1x8x8xf32>, vector<1x8x8xf32>, vector<1x8x8xf32> -> vector<4x8x8xf32>
    %96 = vector.extract_strided_slice %86 {offsets = [0, 32], sizes = [8, 8], strides = [1, 1]} : vector<8x96xf32> to vector<8x8xf32>
    %97 = vector.extract_strided_slice %86 {offsets = [0, 40], sizes = [8, 8], strides = [1, 1]} : vector<8x96xf32> to vector<8x8xf32>
    %98 = vector.extract_strided_slice %86 {offsets = [0, 48], sizes = [8, 8], strides = [1, 1]} : vector<8x96xf32> to vector<8x8xf32>
    %99 = vector.extract_strided_slice %86 {offsets = [0, 56], sizes = [8, 8], strides = [1, 1]} : vector<8x96xf32> to vector<8x8xf32>
    %100 = vector.shape_cast %96 : vector<8x8xf32> to vector<1x8x8xf32>
    %101 = vector.shape_cast %97 : vector<8x8xf32> to vector<1x8x8xf32>
    %102 = vector.shape_cast %98 : vector<8x8xf32> to vector<1x8x8xf32>
    %103 = vector.shape_cast %99 : vector<8x8xf32> to vector<1x8x8xf32>
    %104 = tpu.concatenate %100, %101, %102, %103 in 0 : vector<1x8x8xf32>, vector<1x8x8xf32>, vector<1x8x8xf32>, vector<1x8x8xf32> -> vector<4x8x8xf32>
    %105 = vector.extract_strided_slice %86 {offsets = [0, 64], sizes = [8, 8], strides = [1, 1]} : vector<8x96xf32> to vector<8x8xf32>
    %106 = vector.extract_strided_slice %86 {offsets = [0, 72], sizes = [8, 8], strides = [1, 1]} : vector<8x96xf32> to vector<8x8xf32>
    %107 = vector.extract_strided_slice %86 {offsets = [0, 80], sizes = [8, 8], strides = [1, 1]} : vector<8x96xf32> to vector<8x8xf32>
    %108 = vector.extract_strided_slice %86 {offsets = [0, 88], sizes = [8, 8], strides = [1, 1]} : vector<8x96xf32> to vector<8x8xf32>
    %109 = vector.shape_cast %105 : vector<8x8xf32> to vector<1x8x8xf32>
    %110 = vector.shape_cast %106 : vector<8x8xf32> to vector<1x8x8xf32>
    %111 = vector.shape_cast %107 : vector<8x8xf32> to vector<1x8x8xf32>
    %112 = vector.shape_cast %108 : vector<8x8xf32> to vector<1x8x8xf32>
    %113 = tpu.concatenate %109, %110, %111, %112 in 0 : vector<1x8x8xf32>, vector<1x8x8xf32>, vector<1x8x8xf32>, vector<1x8x8xf32> -> vector<4x8x8xf32>
    "tpu.trace_start"() <{level = 10 : i32, message = "hqd,hkd->hqk"}> : () -> ()
    %cst_23 = arith.constant dense<0.000000e+00> : vector<4x8x8xf32>
    %114 = tpu.matmul %95, %104, %cst_23 {dimension_numbers = #tpu.dot_dimension_numbers<[2], [2], [1], [1], [0, 0, 0, 1, 1, 1], [0], [0]>} : vector<4x8x8xf32>, vector<4x8x8xf32>, vector<4x8x8xf32> -> vector<4x8x8xf32>
    "tpu.trace_stop"() : () -> ()
    %c1 = arith.constant 1 : index
    %c0_24 = arith.constant 0 : index
    %c0_25 = arith.constant 0 : index
    %115 = vector.load %arg2[%c1, %c0_24, %c0_25] : memref<2x1x8xf32, #tpu.memory_space<vmem>>, vector<1x1x8xf32>
    %116 = vector.shape_cast %115 : vector<1x1x8xf32> to vector<1x8xf32>
    %117 = vector.shape_cast %116 : vector<1x8xf32> to vector<1x1x8xf32>
    %118 = vector.broadcast %117 : vector<1x1x8xf32> to vector<4x8x8xf32>
    %119 = arith.addf %114, %118 : vector<4x8x8xf32>
    %cst_26 = arith.constant dense<0xFF800000> : vector<4x8xf32>
    %120 = vector.multi_reduction <maximumf>, %119, %cst_26 [2] : vector<4x8x8xf32> to vector<4x8xf32>
    %121 = vector.shape_cast %120 : vector<4x8xf32> to vector<4x8x1xf32>
    %122 = vector.broadcast %121 : vector<4x8x1xf32> to vector<4x8x8xf32>
    %123 = arith.subf %119, %122 : vector<4x8x8xf32>
    %124 = math.exp %123 : vector<4x8x8xf32>
    %cst_27 = arith.constant dense<0.000000e+00> : vector<4x8xf32>
    %125 = vector.multi_reduction <add>, %124, %cst_27 [2] : vector<4x8x8xf32> to vector<4x8xf32>
    %126 = vector.shape_cast %125 : vector<4x8xf32> to vector<4x8x1xf32>
    %127 = tpu.reciprocal %126 {approx = true} : vector<4x8x1xf32> -> vector<4x8x1xf32>
    %128 = vector.broadcast %127 : vector<4x8x1xf32> to vector<4x8x8xf32>
    %129 = arith.mulf %124, %128 : vector<4x8x8xf32>
    "tpu.trace_start"() <{level = 10 : i32, message = "hqk,hkd->hqd"}> : () -> ()
    %cst_28 = arith.constant dense<0.000000e+00> : vector<4x8x8xf32>
    %130 = tpu.matmul %129, %113, %cst_28 {dimension_numbers = #tpu.dot_dimension_numbers<[2], [1], [1], [2], [0, 0, 0, 1, 1, 2], [0], [0]>} : vector<4x8x8xf32>, vector<4x8x8xf32>, vector<4x8x8xf32> -> vector<4x8x8xf32>
    "tpu.trace_stop"() : () -> ()
    %131 = vector.extract_strided_slice %130 {offsets = [0, 0, 0], sizes = [1, 8, 8], strides = [1, 1, 1]} : vector<4x8x8xf32> to vector<1x8x8xf32>
    %132 = vector.shape_cast %131 : vector<1x8x8xf32> to vector<8x8xf32>
    %133 = vector.extract_strided_slice %130 {offsets = [1, 0, 0], sizes = [1, 8, 8], strides = [1, 1, 1]} : vector<4x8x8xf32> to vector<1x8x8xf32>
    %134 = vector.shape_cast %133 : vector<1x8x8xf32> to vector<8x8xf32>
    %135 = vector.extract_strided_slice %130 {offsets = [2, 0, 0], sizes = [1, 8, 8], strides = [1, 1, 1]} : vector<4x8x8xf32> to vector<1x8x8xf32>
    %136 = vector.shape_cast %135 : vector<1x8x8xf32> to vector<8x8xf32>
    %137 = vector.extract_strided_slice %130 {offsets = [3, 0, 0], sizes = [1, 8, 8], strides = [1, 1, 1]} : vector<4x8x8xf32> to vector<1x8x8xf32>
    %138 = vector.shape_cast %137 : vector<1x8x8xf32> to vector<8x8xf32>
    %139 = tpu.concatenate %132, %134, %136, %138 in 1 : vector<8x8xf32>, vector<8x8xf32>, vector<8x8xf32>, vector<8x8xf32> -> vector<8x32xf32>
    %140 = tpu.concatenate %85, %139 in 0 : vector<8x32xf32>, vector<8x32xf32> -> vector<16x32xf32>
    %c0_29 = arith.constant 0 : index
    %c0_30 = arith.constant 0 : index
    %c0_31 = arith.constant 0 : index
    %141 = vector.load %arg7[%c0_29, %c0_30, %c0_31] : memref<2x32x32xf32, #tpu.memory_space<vmem>>, vector<1x32x32xf32>
    %142 = vector.shape_cast %141 : vector<1x32x32xf32> to vector<32x32xf32>
    %cst_32 = arith.constant dense<0.000000e+00> : vector<16x32xf32>
    %143 = tpu.matmul %140, %142, %cst_32 {dimension_numbers = #tpu.dot_dimension_numbers<[1], [0], [0], [1], [0, 0, 1, 1], [], []>} : vector<16x32xf32>, vector<32x32xf32>, vector<16x32xf32> -> vector<16x32xf32>
    %c0_33 = arith.constant 0 : index
    %c0_34 = arith.constant 0 : index
    %c0_35 = arith.constant 0 : index
    %144 = vector.load %arg8[%c0_33, %c0_34, %c0_35] : memref<2x1x32xf32, #tpu.memory_space<vmem>>, vector<1x1x32xf32>
    %145 = vector.shape_cast %144 : vector<1x1x32xf32> to vector<1x32xf32>
    %146 = vector.broadcast %145 : vector<1x32xf32> to vector<16x32xf32>
    %147 = arith.addf %143, %146 : vector<16x32xf32>
    %148 = arith.addf %147, %24 : vector<16x32xf32>
    %c0_36 = arith.constant 0 : index
    %c0_37 = arith.constant 0 : index
    %c0_38 = arith.constant 0 : index
    %149 = vector.load %arg9[%c0_36, %c0_37, %c0_38] : memref<2x1x32xf32, #tpu.memory_space<vmem>>, vector<1x1x32xf32>
    %150 = vector.shape_cast %149 : vector<1x1x32xf32> to vector<1x32xf32>
    %c0_39 = arith.constant 0 : index
    %c0_40 = arith.constant 0 : index
    %c0_41 = arith.constant 0 : index
    %151 = vector.load %arg10[%c0_39, %c0_40, %c0_41] : memref<2x1x32xf32, #tpu.memory_space<vmem>>, vector<1x1x32xf32>
    %152 = vector.shape_cast %151 : vector<1x1x32xf32> to vector<1x32xf32>
    %cst_42 = arith.constant dense<0.000000e+00> : vector<16xf32>
    %153 = vector.multi_reduction <add>, %148, %cst_42 [1] : vector<16x32xf32> to vector<16xf32>
    %154 = vector.shape_cast %153 : vector<16xf32> to vector<16x1xf32>
    %cst_43 = arith.constant 3.200000e+01 : f32
    %155 = vector.broadcast %cst_43 : f32 to vector<16x1xf32>
    %156 = arith.divf %154, %155 : vector<16x1xf32>
    %157 = vector.broadcast %156 : vector<16x1xf32> to vector<16x32xf32>
    %158 = arith.subf %148, %157 : vector<16x32xf32>
    %159 = arith.mulf %158, %158 : vector<16x32xf32>
    %cst_44 = arith.constant dense<0.000000e+00> : vector<16xf32>
    %160 = vector.multi_reduction <add>, %159, %cst_44 [1] : vector<16x32xf32> to vector<16xf32>
    %161 = vector.shape_cast %160 : vector<16xf32> to vector<16x1xf32>
    %cst_45 = arith.constant 3.200000e+01 : f32
    %162 = vector.broadcast %cst_45 : f32 to vector<16x1xf32>
    %163 = arith.divf %161, %162 : vector<16x1xf32>
    %164 = vector.broadcast %156 : vector<16x1xf32> to vector<16x32xf32>
    %165 = arith.subf %148, %164 : vector<16x32xf32>
    %cst_46 = arith.constant 9.99999974E-6 : f32
    %166 = vector.broadcast %cst_46 : f32 to vector<16x1xf32>
    %167 = arith.addf %163, %166 : vector<16x1xf32>
    %168 = math.rsqrt %167 : vector<16x1xf32>
    %169 = vector.broadcast %168 : vector<16x1xf32> to vector<16x32xf32>
    %170 = arith.mulf %165, %169 : vector<16x32xf32>
    %171 = vector.broadcast %150 : vector<1x32xf32> to vector<16x32xf32>
    %172 = arith.mulf %170, %171 : vector<16x32xf32>
    %173 = vector.broadcast %152 : vector<1x32xf32> to vector<16x32xf32>
    %174 = arith.addf %172, %173 : vector<16x32xf32>
    %c0_47 = arith.constant 0 : index
    %c0_48 = arith.constant 0 : index
    %c0_49 = arith.constant 0 : index
    %175 = vector.load %arg11[%c0_47, %c0_48, %c0_49] : memref<2x32x64xf32, #tpu.memory_space<vmem>>, vector<1x32x64xf32>
    %176 = vector.shape_cast %175 : vector<1x32x64xf32> to vector<32x64xf32>
    %cst_50 = arith.constant dense<0.000000e+00> : vector<16x64xf32>
    %177 = tpu.matmul %174, %176, %cst_50 {dimension_numbers = #tpu.dot_dimension_numbers<[1], [0], [0], [1], [0, 0, 1, 1], [], []>} : vector<16x32xf32>, vector<32x64xf32>, vector<16x64xf32> -> vector<16x64xf32>
    %c0_51 = arith.constant 0 : index
    %c0_52 = arith.constant 0 : index
    %c0_53 = arith.constant 0 : index
    %178 = vector.load %arg12[%c0_51, %c0_52, %c0_53] : memref<2x1x64xf32, #tpu.memory_space<vmem>>, vector<1x1x64xf32>
    %179 = vector.shape_cast %178 : vector<1x1x64xf32> to vector<1x64xf32>
    %180 = vector.broadcast %179 : vector<1x64xf32> to vector<16x64xf32>
    %181 = arith.addf %177, %180 : vector<16x64xf32>
    %cst_54 = arith.constant 5.000000e-01 : f32
    %182 = vector.broadcast %cst_54 : f32 to vector<16x64xf32>
    %183 = arith.mulf %182, %181 : vector<16x64xf32>
    %cst_55 = arith.constant 0.707106769 : f32
    %184 = vector.broadcast %cst_55 : f32 to vector<16x64xf32>
    %185 = arith.mulf %181, %184 : vector<16x64xf32>
    %186 = math.absf %185 : vector<16x64xf32>
    %cst_56 = arith.constant 0.327591091 : f32
    %187 = vector.broadcast %cst_56 : f32 to vector<16x64xf32>
    %188 = arith.mulf %187, %186 : vector<16x64xf32>
    %cst_57 = arith.constant 1.000000e+00 : f32
    %189 = vector.broadcast %cst_57 : f32 to vector<16x64xf32>
    %190 = arith.addf %189, %188 : vector<16x64xf32>
    %cst_58 = arith.constant 1.000000e+00 : f32
    %191 = vector.broadcast %cst_58 : f32 to vector<16x64xf32>
    %192 = arith.divf %191, %190 : vector<16x64xf32>
    %cst_59 = arith.constant 1.06140542 : f32
    %193 = vector.broadcast %cst_59 : f32 to vector<16x64xf32>
    %194 = arith.mulf %193, %192 : vector<16x64xf32>
    %cst_60 = arith.constant -1.45315206 : f32
    %195 = vector.broadcast %cst_60 : f32 to vector<16x64xf32>
    %196 = arith.addf %194, %195 : vector<16x64xf32>
    %197 = arith.mulf %196, %192 : vector<16x64xf32>
    %cst_61 = arith.constant 1.42141378 : f32
    %198 = vector.broadcast %cst_61 : f32 to vector<16x64xf32>
    %199 = arith.addf %197, %198 : vector<16x64xf32>
    %200 = arith.mulf %199, %192 : vector<16x64xf32>
    %cst_62 = arith.constant -0.284496725 : f32
    %201 = vector.broadcast %cst_62 : f32 to vector<16x64xf32>
    %202 = arith.addf %200, %201 : vector<16x64xf32>
    %203 = arith.mulf %202, %192 : vector<16x64xf32>
    %cst_63 = arith.constant 0.254829586 : f32
    %204 = vector.broadcast %cst_63 : f32 to vector<16x64xf32>
    %205 = arith.addf %203, %204 : vector<16x64xf32>
    %206 = arith.mulf %205, %192 : vector<16x64xf32>
    %cst_64 = arith.constant 0.000000e+00 : f32
    %207 = vector.broadcast %cst_64 : f32 to vector<16x64xf32>
    %208 = arith.subf %207, %186 : vector<16x64xf32>
    %209 = arith.mulf %208, %186 : vector<16x64xf32>
    %210 = math.exp %209 : vector<16x64xf32>
    %211 = arith.mulf %206, %210 : vector<16x64xf32>
    %cst_65 = arith.constant 1.000000e+00 : f32
    %212 = vector.broadcast %cst_65 : f32 to vector<16x64xf32>
    %213 = arith.subf %212, %211 : vector<16x64xf32>
    %cst_66 = arith.constant 0.000000e+00 : f32
    %214 = vector.broadcast %cst_66 : f32 to vector<16x64xf32>
    %215 = arith.cmpf oge, %185, %214 : vector<16x64xf32>
    %cst_67 = arith.constant 0.000000e+00 : f32
    %216 = vector.broadcast %cst_67 : f32 to vector<16x64xf32>
    %217 = arith.subf %216, %213 : vector<16x64xf32>
    %218 = arith.select %215, %213, %217 : vector<16x64xi1>, vector<16x64xf32>
    %cst_68 = arith.constant 1.000000e+00 : f32
    %219 = vector.broadcast %cst_68 : f32 to vector<16x64xf32>
    %220 = arith.addf %219, %218 : vector<16x64xf32>
    %221 = arith.mulf %183, %220 : vector<16x64xf32>
    %c0_69 = arith.constant 0 : index
    %c0_70 = arith.constant 0 : index
    %c0_71 = arith.constant 0 : index
    %222 = vector.load %arg13[%c0_69, %c0_70, %c0_71] : memref<2x64x32xf32, #tpu.memory_space<vmem>>, vector<1x64x32xf32>
    %223 = vector.shape_cast %222 : vector<1x64x32xf32> to vector<64x32xf32>
    %cst_72 = arith.constant dense<0.000000e+00> : vector<16x32xf32>
    %224 = tpu.matmul %221, %223, %cst_72 {dimension_numbers = #tpu.dot_dimension_numbers<[1], [0], [0], [1], [0, 0, 1, 1], [], []>} : vector<16x64xf32>, vector<64x32xf32>, vector<16x32xf32> -> vector<16x32xf32>
    %c0_73 = arith.constant 0 : index
    %c0_74 = arith.constant 0 : index
    %c0_75 = arith.constant 0 : index
    %225 = vector.load %arg14[%c0_73, %c0_74, %c0_75] : memref<2x1x32xf32, #tpu.memory_space<vmem>>, vector<1x1x32xf32>
    %226 = vector.shape_cast %225 : vector<1x1x32xf32> to vector<1x32xf32>
    %227 = vector.broadcast %226 : vector<1x32xf32> to vector<16x32xf32>
    %228 = arith.addf %224, %227 : vector<16x32xf32>
    %229 = arith.addf %228, %174 : vector<16x32xf32>
    %c0_76 = arith.constant 0 : index
    %c0_77 = arith.constant 0 : index
    %c0_78 = arith.constant 0 : index
    %230 = vector.load %arg15[%c0_76, %c0_77, %c0_78] : memref<2x1x32xf32, #tpu.memory_space<vmem>>, vector<1x1x32xf32>
    %231 = vector.shape_cast %230 : vector<1x1x32xf32> to vector<1x32xf32>
    %c0_79 = arith.constant 0 : index
    %c0_80 = arith.constant 0 : index
    %c0_81 = arith.constant 0 : index
    %232 = vector.load %arg16[%c0_79, %c0_80, %c0_81] : memref<2x1x32xf32, #tpu.memory_space<vmem>>, vector<1x1x32xf32>
    %233 = vector.shape_cast %232 : vector<1x1x32xf32> to vector<1x32xf32>
    %cst_82 = arith.constant dense<0.000000e+00> : vector<16xf32>
    %234 = vector.multi_reduction <add>, %229, %cst_82 [1] : vector<16x32xf32> to vector<16xf32>
    %235 = vector.shape_cast %234 : vector<16xf32> to vector<16x1xf32>
    %cst_83 = arith.constant 3.200000e+01 : f32
    %236 = vector.broadcast %cst_83 : f32 to vector<16x1xf32>
    %237 = arith.divf %235, %236 : vector<16x1xf32>
    %238 = vector.broadcast %237 : vector<16x1xf32> to vector<16x32xf32>
    %239 = arith.subf %229, %238 : vector<16x32xf32>
    %240 = arith.mulf %239, %239 : vector<16x32xf32>
    %cst_84 = arith.constant dense<0.000000e+00> : vector<16xf32>
    %241 = vector.multi_reduction <add>, %240, %cst_84 [1] : vector<16x32xf32> to vector<16xf32>
    %242 = vector.shape_cast %241 : vector<16xf32> to vector<16x1xf32>
    %cst_85 = arith.constant 3.200000e+01 : f32
    %243 = vector.broadcast %cst_85 : f32 to vector<16x1xf32>
    %244 = arith.divf %242, %243 : vector<16x1xf32>
    %245 = vector.broadcast %237 : vector<16x1xf32> to vector<16x32xf32>
    %246 = arith.subf %229, %245 : vector<16x32xf32>
    %cst_86 = arith.constant 9.99999974E-6 : f32
    %247 = vector.broadcast %cst_86 : f32 to vector<16x1xf32>
    %248 = arith.addf %244, %247 : vector<16x1xf32>
    %249 = math.rsqrt %248 : vector<16x1xf32>
    %250 = vector.broadcast %249 : vector<16x1xf32> to vector<16x32xf32>
    %251 = arith.mulf %246, %250 : vector<16x32xf32>
    %252 = vector.broadcast %231 : vector<1x32xf32> to vector<16x32xf32>
    %253 = arith.mulf %251, %252 : vector<16x32xf32>
    %254 = vector.broadcast %233 : vector<1x32xf32> to vector<16x32xf32>
    %255 = arith.addf %253, %254 : vector<16x32xf32>
    %c1_87 = arith.constant 1 : index
    %c0_88 = arith.constant 0 : index
    %c0_89 = arith.constant 0 : index
    %256 = vector.load %arg5[%c1_87, %c0_88, %c0_89] : memref<2x32x96xf32, #tpu.memory_space<vmem>>, vector<1x32x96xf32>
    %257 = vector.shape_cast %256 : vector<1x32x96xf32> to vector<32x96xf32>
    %cst_90 = arith.constant dense<0.000000e+00> : vector<16x96xf32>
    %258 = tpu.matmul %255, %257, %cst_90 {dimension_numbers = #tpu.dot_dimension_numbers<[1], [0], [0], [1], [0, 0, 1, 1], [], []>} : vector<16x32xf32>, vector<32x96xf32>, vector<16x96xf32> -> vector<16x96xf32>
    %c1_91 = arith.constant 1 : index
    %c0_92 = arith.constant 0 : index
    %c0_93 = arith.constant 0 : index
    %259 = vector.load %arg6[%c1_91, %c0_92, %c0_93] : memref<2x1x96xf32, #tpu.memory_space<vmem>>, vector<1x1x96xf32>
    %260 = vector.shape_cast %259 : vector<1x1x96xf32> to vector<1x96xf32>
    %261 = vector.broadcast %260 : vector<1x96xf32> to vector<16x96xf32>
    %262 = arith.addf %258, %261 : vector<16x96xf32>
    %263 = vector.extract_strided_slice %262 {offsets = [0, 0], sizes = [8, 96], strides = [1, 1]} : vector<16x96xf32> to vector<8x96xf32>
    %264 = vector.extract_strided_slice %263 {offsets = [0, 0], sizes = [8, 8], strides = [1, 1]} : vector<8x96xf32> to vector<8x8xf32>
    %265 = vector.extract_strided_slice %263 {offsets = [0, 8], sizes = [8, 8], strides = [1, 1]} : vector<8x96xf32> to vector<8x8xf32>
    %266 = vector.extract_strided_slice %263 {offsets = [0, 16], sizes = [8, 8], strides = [1, 1]} : vector<8x96xf32> to vector<8x8xf32>
    %267 = vector.extract_strided_slice %263 {offsets = [0, 24], sizes = [8, 8], strides = [1, 1]} : vector<8x96xf32> to vector<8x8xf32>
    %268 = vector.shape_cast %264 : vector<8x8xf32> to vector<1x8x8xf32>
    %269 = vector.shape_cast %265 : vector<8x8xf32> to vector<1x8x8xf32>
    %270 = vector.shape_cast %266 : vector<8x8xf32> to vector<1x8x8xf32>
    %271 = vector.shape_cast %267 : vector<8x8xf32> to vector<1x8x8xf32>
    %272 = tpu.concatenate %268, %269, %270, %271 in 0 : vector<1x8x8xf32>, vector<1x8x8xf32>, vector<1x8x8xf32>, vector<1x8x8xf32> -> vector<4x8x8xf32>
    %273 = vector.extract_strided_slice %263 {offsets = [0, 32], sizes = [8, 8], strides = [1, 1]} : vector<8x96xf32> to vector<8x8xf32>
    %274 = vector.extract_strided_slice %263 {offsets = [0, 40], sizes = [8, 8], strides = [1, 1]} : vector<8x96xf32> to vector<8x8xf32>
    %275 = vector.extract_strided_slice %263 {offsets = [0, 48], sizes = [8, 8], strides = [1, 1]} : vector<8x96xf32> to vector<8x8xf32>
    %276 = vector.extract_strided_slice %263 {offsets = [0, 56], sizes = [8, 8], strides = [1, 1]} : vector<8x96xf32> to vector<8x8xf32>
    %277 = vector.shape_cast %273 : vector<8x8xf32> to vector<1x8x8xf32>
    %278 = vector.shape_cast %274 : vector<8x8xf32> to vector<1x8x8xf32>
    %279 = vector.shape_cast %275 : vector<8x8xf32> to vector<1x8x8xf32>
    %280 = vector.shape_cast %276 : vector<8x8xf32> to vector<1x8x8xf32>
    %281 = tpu.concatenate %277, %278, %279, %280 in 0 : vector<1x8x8xf32>, vector<1x8x8xf32>, vector<1x8x8xf32>, vector<1x8x8xf32> -> vector<4x8x8xf32>
    %282 = vector.extract_strided_slice %263 {offsets = [0, 64], sizes = [8, 8], strides = [1, 1]} : vector<8x96xf32> to vector<8x8xf32>
    %283 = vector.extract_strided_slice %263 {offsets = [0, 72], sizes = [8, 8], strides = [1, 1]} : vector<8x96xf32> to vector<8x8xf32>
    %284 = vector.extract_strided_slice %263 {offsets = [0, 80], sizes = [8, 8], strides = [1, 1]} : vector<8x96xf32> to vector<8x8xf32>
    %285 = vector.extract_strided_slice %263 {offsets = [0, 88], sizes = [8, 8], strides = [1, 1]} : vector<8x96xf32> to vector<8x8xf32>
    %286 = vector.shape_cast %282 : vector<8x8xf32> to vector<1x8x8xf32>
    %287 = vector.shape_cast %283 : vector<8x8xf32> to vector<1x8x8xf32>
    %288 = vector.shape_cast %284 : vector<8x8xf32> to vector<1x8x8xf32>
    %289 = vector.shape_cast %285 : vector<8x8xf32> to vector<1x8x8xf32>
    %290 = tpu.concatenate %286, %287, %288, %289 in 0 : vector<1x8x8xf32>, vector<1x8x8xf32>, vector<1x8x8xf32>, vector<1x8x8xf32> -> vector<4x8x8xf32>
    "tpu.trace_start"() <{level = 10 : i32, message = "hqd,hkd->hqk"}> : () -> ()
    %cst_94 = arith.constant dense<0.000000e+00> : vector<4x8x8xf32>
    %291 = tpu.matmul %272, %281, %cst_94 {dimension_numbers = #tpu.dot_dimension_numbers<[2], [2], [1], [1], [0, 0, 0, 1, 1, 1], [0], [0]>} : vector<4x8x8xf32>, vector<4x8x8xf32>, vector<4x8x8xf32> -> vector<4x8x8xf32>
    "tpu.trace_stop"() : () -> ()
    %c0_95 = arith.constant 0 : index
    %c0_96 = arith.constant 0 : index
    %c0_97 = arith.constant 0 : index
    %292 = vector.load %arg2[%c0_95, %c0_96, %c0_97] : memref<2x1x8xf32, #tpu.memory_space<vmem>>, vector<1x1x8xf32>
    %293 = vector.shape_cast %292 : vector<1x1x8xf32> to vector<1x8xf32>
    %294 = vector.shape_cast %293 : vector<1x8xf32> to vector<1x1x8xf32>
    %295 = vector.broadcast %294 : vector<1x1x8xf32> to vector<4x8x8xf32>
    %296 = arith.addf %291, %295 : vector<4x8x8xf32>
    %cst_98 = arith.constant dense<0xFF800000> : vector<4x8xf32>
    %297 = vector.multi_reduction <maximumf>, %296, %cst_98 [2] : vector<4x8x8xf32> to vector<4x8xf32>
    %298 = vector.shape_cast %297 : vector<4x8xf32> to vector<4x8x1xf32>
    %299 = vector.broadcast %298 : vector<4x8x1xf32> to vector<4x8x8xf32>
    %300 = arith.subf %296, %299 : vector<4x8x8xf32>
    %301 = math.exp %300 : vector<4x8x8xf32>
    %cst_99 = arith.constant dense<0.000000e+00> : vector<4x8xf32>
    %302 = vector.multi_reduction <add>, %301, %cst_99 [2] : vector<4x8x8xf32> to vector<4x8xf32>
    %303 = vector.shape_cast %302 : vector<4x8xf32> to vector<4x8x1xf32>
    %304 = tpu.reciprocal %303 {approx = true} : vector<4x8x1xf32> -> vector<4x8x1xf32>
    %305 = vector.broadcast %304 : vector<4x8x1xf32> to vector<4x8x8xf32>
    %306 = arith.mulf %301, %305 : vector<4x8x8xf32>
    "tpu.trace_start"() <{level = 10 : i32, message = "hqk,hkd->hqd"}> : () -> ()
    %cst_100 = arith.constant dense<0.000000e+00> : vector<4x8x8xf32>
    %307 = tpu.matmul %306, %290, %cst_100 {dimension_numbers = #tpu.dot_dimension_numbers<[2], [1], [1], [2], [0, 0, 0, 1, 1, 2], [0], [0]>} : vector<4x8x8xf32>, vector<4x8x8xf32>, vector<4x8x8xf32> -> vector<4x8x8xf32>
    "tpu.trace_stop"() : () -> ()
    %308 = vector.extract_strided_slice %307 {offsets = [0, 0, 0], sizes = [1, 8, 8], strides = [1, 1, 1]} : vector<4x8x8xf32> to vector<1x8x8xf32>
    %309 = vector.shape_cast %308 : vector<1x8x8xf32> to vector<8x8xf32>
    %310 = vector.extract_strided_slice %307 {offsets = [1, 0, 0], sizes = [1, 8, 8], strides = [1, 1, 1]} : vector<4x8x8xf32> to vector<1x8x8xf32>
    %311 = vector.shape_cast %310 : vector<1x8x8xf32> to vector<8x8xf32>
    %312 = vector.extract_strided_slice %307 {offsets = [2, 0, 0], sizes = [1, 8, 8], strides = [1, 1, 1]} : vector<4x8x8xf32> to vector<1x8x8xf32>
    %313 = vector.shape_cast %312 : vector<1x8x8xf32> to vector<8x8xf32>
    %314 = vector.extract_strided_slice %307 {offsets = [3, 0, 0], sizes = [1, 8, 8], strides = [1, 1, 1]} : vector<4x8x8xf32> to vector<1x8x8xf32>
    %315 = vector.shape_cast %314 : vector<1x8x8xf32> to vector<8x8xf32>
    %316 = tpu.concatenate %309, %311, %313, %315 in 1 : vector<8x8xf32>, vector<8x8xf32>, vector<8x8xf32>, vector<8x8xf32> -> vector<8x32xf32>
    %317 = vector.extract_strided_slice %262 {offsets = [8, 0], sizes = [8, 96], strides = [1, 1]} : vector<16x96xf32> to vector<8x96xf32>
    %318 = vector.extract_strided_slice %317 {offsets = [0, 0], sizes = [8, 8], strides = [1, 1]} : vector<8x96xf32> to vector<8x8xf32>
    %319 = vector.extract_strided_slice %317 {offsets = [0, 8], sizes = [8, 8], strides = [1, 1]} : vector<8x96xf32> to vector<8x8xf32>
    %320 = vector.extract_strided_slice %317 {offsets = [0, 16], sizes = [8, 8], strides = [1, 1]} : vector<8x96xf32> to vector<8x8xf32>
    %321 = vector.extract_strided_slice %317 {offsets = [0, 24], sizes = [8, 8], strides = [1, 1]} : vector<8x96xf32> to vector<8x8xf32>
    %322 = vector.shape_cast %318 : vector<8x8xf32> to vector<1x8x8xf32>
    %323 = vector.shape_cast %319 : vector<8x8xf32> to vector<1x8x8xf32>
    %324 = vector.shape_cast %320 : vector<8x8xf32> to vector<1x8x8xf32>
    %325 = vector.shape_cast %321 : vector<8x8xf32> to vector<1x8x8xf32>
    %326 = tpu.concatenate %322, %323, %324, %325 in 0 : vector<1x8x8xf32>, vector<1x8x8xf32>, vector<1x8x8xf32>, vector<1x8x8xf32> -> vector<4x8x8xf32>
    %327 = vector.extract_strided_slice %317 {offsets = [0, 32], sizes = [8, 8], strides = [1, 1]} : vector<8x96xf32> to vector<8x8xf32>
    %328 = vector.extract_strided_slice %317 {offsets = [0, 40], sizes = [8, 8], strides = [1, 1]} : vector<8x96xf32> to vector<8x8xf32>
    %329 = vector.extract_strided_slice %317 {offsets = [0, 48], sizes = [8, 8], strides = [1, 1]} : vector<8x96xf32> to vector<8x8xf32>
    %330 = vector.extract_strided_slice %317 {offsets = [0, 56], sizes = [8, 8], strides = [1, 1]} : vector<8x96xf32> to vector<8x8xf32>
    %331 = vector.shape_cast %327 : vector<8x8xf32> to vector<1x8x8xf32>
    %332 = vector.shape_cast %328 : vector<8x8xf32> to vector<1x8x8xf32>
    %333 = vector.shape_cast %329 : vector<8x8xf32> to vector<1x8x8xf32>
    %334 = vector.shape_cast %330 : vector<8x8xf32> to vector<1x8x8xf32>
    %335 = tpu.concatenate %331, %332, %333, %334 in 0 : vector<1x8x8xf32>, vector<1x8x8xf32>, vector<1x8x8xf32>, vector<1x8x8xf32> -> vector<4x8x8xf32>
    %336 = vector.extract_strided_slice %317 {offsets = [0, 64], sizes = [8, 8], strides = [1, 1]} : vector<8x96xf32> to vector<8x8xf32>
    %337 = vector.extract_strided_slice %317 {offsets = [0, 72], sizes = [8, 8], strides = [1, 1]} : vector<8x96xf32> to vector<8x8xf32>
    %338 = vector.extract_strided_slice %317 {offsets = [0, 80], sizes = [8, 8], strides = [1, 1]} : vector<8x96xf32> to vector<8x8xf32>
    %339 = vector.extract_strided_slice %317 {offsets = [0, 88], sizes = [8, 8], strides = [1, 1]} : vector<8x96xf32> to vector<8x8xf32>
    %340 = vector.shape_cast %336 : vector<8x8xf32> to vector<1x8x8xf32>
    %341 = vector.shape_cast %337 : vector<8x8xf32> to vector<1x8x8xf32>
    %342 = vector.shape_cast %338 : vector<8x8xf32> to vector<1x8x8xf32>
    %343 = vector.shape_cast %339 : vector<8x8xf32> to vector<1x8x8xf32>
    %344 = tpu.concatenate %340, %341, %342, %343 in 0 : vector<1x8x8xf32>, vector<1x8x8xf32>, vector<1x8x8xf32>, vector<1x8x8xf32> -> vector<4x8x8xf32>
    "tpu.trace_start"() <{level = 10 : i32, message = "hqd,hkd->hqk"}> : () -> ()
    %cst_101 = arith.constant dense<0.000000e+00> : vector<4x8x8xf32>
    %345 = tpu.matmul %326, %335, %cst_101 {dimension_numbers = #tpu.dot_dimension_numbers<[2], [2], [1], [1], [0, 0, 0, 1, 1, 1], [0], [0]>} : vector<4x8x8xf32>, vector<4x8x8xf32>, vector<4x8x8xf32> -> vector<4x8x8xf32>
    "tpu.trace_stop"() : () -> ()
    %c1_102 = arith.constant 1 : index
    %c0_103 = arith.constant 0 : index
    %c0_104 = arith.constant 0 : index
    %346 = vector.load %arg2[%c1_102, %c0_103, %c0_104] : memref<2x1x8xf32, #tpu.memory_space<vmem>>, vector<1x1x8xf32>
    %347 = vector.shape_cast %346 : vector<1x1x8xf32> to vector<1x8xf32>
    %348 = vector.shape_cast %347 : vector<1x8xf32> to vector<1x1x8xf32>
    %349 = vector.broadcast %348 : vector<1x1x8xf32> to vector<4x8x8xf32>
    %350 = arith.addf %345, %349 : vector<4x8x8xf32>
    %cst_105 = arith.constant dense<0xFF800000> : vector<4x8xf32>
    %351 = vector.multi_reduction <maximumf>, %350, %cst_105 [2] : vector<4x8x8xf32> to vector<4x8xf32>
    %352 = vector.shape_cast %351 : vector<4x8xf32> to vector<4x8x1xf32>
    %353 = vector.broadcast %352 : vector<4x8x1xf32> to vector<4x8x8xf32>
    %354 = arith.subf %350, %353 : vector<4x8x8xf32>
    %355 = math.exp %354 : vector<4x8x8xf32>
    %cst_106 = arith.constant dense<0.000000e+00> : vector<4x8xf32>
    %356 = vector.multi_reduction <add>, %355, %cst_106 [2] : vector<4x8x8xf32> to vector<4x8xf32>
    %357 = vector.shape_cast %356 : vector<4x8xf32> to vector<4x8x1xf32>
    %358 = tpu.reciprocal %357 {approx = true} : vector<4x8x1xf32> -> vector<4x8x1xf32>
    %359 = vector.broadcast %358 : vector<4x8x1xf32> to vector<4x8x8xf32>
    %360 = arith.mulf %355, %359 : vector<4x8x8xf32>
    "tpu.trace_start"() <{level = 10 : i32, message = "hqk,hkd->hqd"}> : () -> ()
    %cst_107 = arith.constant dense<0.000000e+00> : vector<4x8x8xf32>
    %361 = tpu.matmul %360, %344, %cst_107 {dimension_numbers = #tpu.dot_dimension_numbers<[2], [1], [1], [2], [0, 0, 0, 1, 1, 2], [0], [0]>} : vector<4x8x8xf32>, vector<4x8x8xf32>, vector<4x8x8xf32> -> vector<4x8x8xf32>
    "tpu.trace_stop"() : () -> ()
    %362 = vector.extract_strided_slice %361 {offsets = [0, 0, 0], sizes = [1, 8, 8], strides = [1, 1, 1]} : vector<4x8x8xf32> to vector<1x8x8xf32>
    %363 = vector.shape_cast %362 : vector<1x8x8xf32> to vector<8x8xf32>
    %364 = vector.extract_strided_slice %361 {offsets = [1, 0, 0], sizes = [1, 8, 8], strides = [1, 1, 1]} : vector<4x8x8xf32> to vector<1x8x8xf32>
    %365 = vector.shape_cast %364 : vector<1x8x8xf32> to vector<8x8xf32>
    %366 = vector.extract_strided_slice %361 {offsets = [2, 0, 0], sizes = [1, 8, 8], strides = [1, 1, 1]} : vector<4x8x8xf32> to vector<1x8x8xf32>
    %367 = vector.shape_cast %366 : vector<1x8x8xf32> to vector<8x8xf32>
    %368 = vector.extract_strided_slice %361 {offsets = [3, 0, 0], sizes = [1, 8, 8], strides = [1, 1, 1]} : vector<4x8x8xf32> to vector<1x8x8xf32>
    %369 = vector.shape_cast %368 : vector<1x8x8xf32> to vector<8x8xf32>
    %370 = tpu.concatenate %363, %365, %367, %369 in 1 : vector<8x8xf32>, vector<8x8xf32>, vector<8x8xf32>, vector<8x8xf32> -> vector<8x32xf32>
    %371 = tpu.concatenate %316, %370 in 0 : vector<8x32xf32>, vector<8x32xf32> -> vector<16x32xf32>
    %c1_108 = arith.constant 1 : index
    %c0_109 = arith.constant 0 : index
    %c0_110 = arith.constant 0 : index
    %372 = vector.load %arg7[%c1_108, %c0_109, %c0_110] : memref<2x32x32xf32, #tpu.memory_space<vmem>>, vector<1x32x32xf32>
    %373 = vector.shape_cast %372 : vector<1x32x32xf32> to vector<32x32xf32>
    %cst_111 = arith.constant dense<0.000000e+00> : vector<16x32xf32>
    %374 = tpu.matmul %371, %373, %cst_111 {dimension_numbers = #tpu.dot_dimension_numbers<[1], [0], [0], [1], [0, 0, 1, 1], [], []>} : vector<16x32xf32>, vector<32x32xf32>, vector<16x32xf32> -> vector<16x32xf32>
    %c1_112 = arith.constant 1 : index
    %c0_113 = arith.constant 0 : index
    %c0_114 = arith.constant 0 : index
    %375 = vector.load %arg8[%c1_112, %c0_113, %c0_114] : memref<2x1x32xf32, #tpu.memory_space<vmem>>, vector<1x1x32xf32>
    %376 = vector.shape_cast %375 : vector<1x1x32xf32> to vector<1x32xf32>
    %377 = vector.broadcast %376 : vector<1x32xf32> to vector<16x32xf32>
    %378 = arith.addf %374, %377 : vector<16x32xf32>
    %379 = arith.addf %378, %255 : vector<16x32xf32>
    %c1_115 = arith.constant 1 : index
    %c0_116 = arith.constant 0 : index
    %c0_117 = arith.constant 0 : index
    %380 = vector.load %arg9[%c1_115, %c0_116, %c0_117] : memref<2x1x32xf32, #tpu.memory_space<vmem>>, vector<1x1x32xf32>
    %381 = vector.shape_cast %380 : vector<1x1x32xf32> to vector<1x32xf32>
    %c1_118 = arith.constant 1 : index
    %c0_119 = arith.constant 0 : index
    %c0_120 = arith.constant 0 : index
    %382 = vector.load %arg10[%c1_118, %c0_119, %c0_120] : memref<2x1x32xf32, #tpu.memory_space<vmem>>, vector<1x1x32xf32>
    %383 = vector.shape_cast %382 : vector<1x1x32xf32> to vector<1x32xf32>
    %cst_121 = arith.constant dense<0.000000e+00> : vector<16xf32>
    %384 = vector.multi_reduction <add>, %379, %cst_121 [1] : vector<16x32xf32> to vector<16xf32>
    %385 = vector.shape_cast %384 : vector<16xf32> to vector<16x1xf32>
    %cst_122 = arith.constant 3.200000e+01 : f32
    %386 = vector.broadcast %cst_122 : f32 to vector<16x1xf32>
    %387 = arith.divf %385, %386 : vector<16x1xf32>
    %388 = vector.broadcast %387 : vector<16x1xf32> to vector<16x32xf32>
    %389 = arith.subf %379, %388 : vector<16x32xf32>
    %390 = arith.mulf %389, %389 : vector<16x32xf32>
    %cst_123 = arith.constant dense<0.000000e+00> : vector<16xf32>
    %391 = vector.multi_reduction <add>, %390, %cst_123 [1] : vector<16x32xf32> to vector<16xf32>
    %392 = vector.shape_cast %391 : vector<16xf32> to vector<16x1xf32>
    %cst_124 = arith.constant 3.200000e+01 : f32
    %393 = vector.broadcast %cst_124 : f32 to vector<16x1xf32>
    %394 = arith.divf %392, %393 : vector<16x1xf32>
    %395 = vector.broadcast %387 : vector<16x1xf32> to vector<16x32xf32>
    %396 = arith.subf %379, %395 : vector<16x32xf32>
    %cst_125 = arith.constant 9.99999974E-6 : f32
    %397 = vector.broadcast %cst_125 : f32 to vector<16x1xf32>
    %398 = arith.addf %394, %397 : vector<16x1xf32>
    %399 = math.rsqrt %398 : vector<16x1xf32>
    %400 = vector.broadcast %399 : vector<16x1xf32> to vector<16x32xf32>
    %401 = arith.mulf %396, %400 : vector<16x32xf32>
    %402 = vector.broadcast %381 : vector<1x32xf32> to vector<16x32xf32>
    %403 = arith.mulf %401, %402 : vector<16x32xf32>
    %404 = vector.broadcast %383 : vector<1x32xf32> to vector<16x32xf32>
    %405 = arith.addf %403, %404 : vector<16x32xf32>
    %c1_126 = arith.constant 1 : index
    %c0_127 = arith.constant 0 : index
    %c0_128 = arith.constant 0 : index
    %406 = vector.load %arg11[%c1_126, %c0_127, %c0_128] : memref<2x32x64xf32, #tpu.memory_space<vmem>>, vector<1x32x64xf32>
    %407 = vector.shape_cast %406 : vector<1x32x64xf32> to vector<32x64xf32>
    %cst_129 = arith.constant dense<0.000000e+00> : vector<16x64xf32>
    %408 = tpu.matmul %405, %407, %cst_129 {dimension_numbers = #tpu.dot_dimension_numbers<[1], [0], [0], [1], [0, 0, 1, 1], [], []>} : vector<16x32xf32>, vector<32x64xf32>, vector<16x64xf32> -> vector<16x64xf32>
    %c1_130 = arith.constant 1 : index
    %c0_131 = arith.constant 0 : index
    %c0_132 = arith.constant 0 : index
    %409 = vector.load %arg12[%c1_130, %c0_131, %c0_132] : memref<2x1x64xf32, #tpu.memory_space<vmem>>, vector<1x1x64xf32>
    %410 = vector.shape_cast %409 : vector<1x1x64xf32> to vector<1x64xf32>
    %411 = vector.broadcast %410 : vector<1x64xf32> to vector<16x64xf32>
    %412 = arith.addf %408, %411 : vector<16x64xf32>
    %cst_133 = arith.constant 5.000000e-01 : f32
    %413 = vector.broadcast %cst_133 : f32 to vector<16x64xf32>
    %414 = arith.mulf %413, %412 : vector<16x64xf32>
    %cst_134 = arith.constant 0.707106769 : f32
    %415 = vector.broadcast %cst_134 : f32 to vector<16x64xf32>
    %416 = arith.mulf %412, %415 : vector<16x64xf32>
    %417 = math.absf %416 : vector<16x64xf32>
    %cst_135 = arith.constant 0.327591091 : f32
    %418 = vector.broadcast %cst_135 : f32 to vector<16x64xf32>
    %419 = arith.mulf %418, %417 : vector<16x64xf32>
    %cst_136 = arith.constant 1.000000e+00 : f32
    %420 = vector.broadcast %cst_136 : f32 to vector<16x64xf32>
    %421 = arith.addf %420, %419 : vector<16x64xf32>
    %cst_137 = arith.constant 1.000000e+00 : f32
    %422 = vector.broadcast %cst_137 : f32 to vector<16x64xf32>
    %423 = arith.divf %422, %421 : vector<16x64xf32>
    %cst_138 = arith.constant 1.06140542 : f32
    %424 = vector.broadcast %cst_138 : f32 to vector<16x64xf32>
    %425 = arith.mulf %424, %423 : vector<16x64xf32>
    %cst_139 = arith.constant -1.45315206 : f32
    %426 = vector.broadcast %cst_139 : f32 to vector<16x64xf32>
    %427 = arith.addf %425, %426 : vector<16x64xf32>
    %428 = arith.mulf %427, %423 : vector<16x64xf32>
    %cst_140 = arith.constant 1.42141378 : f32
    %429 = vector.broadcast %cst_140 : f32 to vector<16x64xf32>
    %430 = arith.addf %428, %429 : vector<16x64xf32>
    %431 = arith.mulf %430, %423 : vector<16x64xf32>
    %cst_141 = arith.constant -0.284496725 : f32
    %432 = vector.broadcast %cst_141 : f32 to vector<16x64xf32>
    %433 = arith.addf %431, %432 : vector<16x64xf32>
    %434 = arith.mulf %433, %423 : vector<16x64xf32>
    %cst_142 = arith.constant 0.254829586 : f32
    %435 = vector.broadcast %cst_142 : f32 to vector<16x64xf32>
    %436 = arith.addf %434, %435 : vector<16x64xf32>
    %437 = arith.mulf %436, %423 : vector<16x64xf32>
    %cst_143 = arith.constant 0.000000e+00 : f32
    %438 = vector.broadcast %cst_143 : f32 to vector<16x64xf32>
    %439 = arith.subf %438, %417 : vector<16x64xf32>
    %440 = arith.mulf %439, %417 : vector<16x64xf32>
    %441 = math.exp %440 : vector<16x64xf32>
    %442 = arith.mulf %437, %441 : vector<16x64xf32>
    %cst_144 = arith.constant 1.000000e+00 : f32
    %443 = vector.broadcast %cst_144 : f32 to vector<16x64xf32>
    %444 = arith.subf %443, %442 : vector<16x64xf32>
    %cst_145 = arith.constant 0.000000e+00 : f32
    %445 = vector.broadcast %cst_145 : f32 to vector<16x64xf32>
    %446 = arith.cmpf oge, %416, %445 : vector<16x64xf32>
    %cst_146 = arith.constant 0.000000e+00 : f32
    %447 = vector.broadcast %cst_146 : f32 to vector<16x64xf32>
    %448 = arith.subf %447, %444 : vector<16x64xf32>
    %449 = arith.select %446, %444, %448 : vector<16x64xi1>, vector<16x64xf32>
    %cst_147 = arith.constant 1.000000e+00 : f32
    %450 = vector.broadcast %cst_147 : f32 to vector<16x64xf32>
    %451 = arith.addf %450, %449 : vector<16x64xf32>
    %452 = arith.mulf %414, %451 : vector<16x64xf32>
    %c1_148 = arith.constant 1 : index
    %c0_149 = arith.constant 0 : index
    %c0_150 = arith.constant 0 : index
    %453 = vector.load %arg13[%c1_148, %c0_149, %c0_150] : memref<2x64x32xf32, #tpu.memory_space<vmem>>, vector<1x64x32xf32>
    %454 = vector.shape_cast %453 : vector<1x64x32xf32> to vector<64x32xf32>
    %cst_151 = arith.constant dense<0.000000e+00> : vector<16x32xf32>
    %455 = tpu.matmul %452, %454, %cst_151 {dimension_numbers = #tpu.dot_dimension_numbers<[1], [0], [0], [1], [0, 0, 1, 1], [], []>} : vector<16x64xf32>, vector<64x32xf32>, vector<16x32xf32> -> vector<16x32xf32>
    %c1_152 = arith.constant 1 : index
    %c0_153 = arith.constant 0 : index
    %c0_154 = arith.constant 0 : index
    %456 = vector.load %arg14[%c1_152, %c0_153, %c0_154] : memref<2x1x32xf32, #tpu.memory_space<vmem>>, vector<1x1x32xf32>
    %457 = vector.shape_cast %456 : vector<1x1x32xf32> to vector<1x32xf32>
    %458 = vector.broadcast %457 : vector<1x32xf32> to vector<16x32xf32>
    %459 = arith.addf %455, %458 : vector<16x32xf32>
    %460 = arith.addf %459, %405 : vector<16x32xf32>
    %c1_155 = arith.constant 1 : index
    %c0_156 = arith.constant 0 : index
    %c0_157 = arith.constant 0 : index
    %461 = vector.load %arg15[%c1_155, %c0_156, %c0_157] : memref<2x1x32xf32, #tpu.memory_space<vmem>>, vector<1x1x32xf32>
    %462 = vector.shape_cast %461 : vector<1x1x32xf32> to vector<1x32xf32>
    %c1_158 = arith.constant 1 : index
    %c0_159 = arith.constant 0 : index
    %c0_160 = arith.constant 0 : index
    %463 = vector.load %arg16[%c1_158, %c0_159, %c0_160] : memref<2x1x32xf32, #tpu.memory_space<vmem>>, vector<1x1x32xf32>
    %464 = vector.shape_cast %463 : vector<1x1x32xf32> to vector<1x32xf32>
    %cst_161 = arith.constant dense<0.000000e+00> : vector<16xf32>
    %465 = vector.multi_reduction <add>, %460, %cst_161 [1] : vector<16x32xf32> to vector<16xf32>
    %466 = vector.shape_cast %465 : vector<16xf32> to vector<16x1xf32>
    %cst_162 = arith.constant 3.200000e+01 : f32
    %467 = vector.broadcast %cst_162 : f32 to vector<16x1xf32>
    %468 = arith.divf %466, %467 : vector<16x1xf32>
    %469 = vector.broadcast %468 : vector<16x1xf32> to vector<16x32xf32>
    %470 = arith.subf %460, %469 : vector<16x32xf32>
    %471 = arith.mulf %470, %470 : vector<16x32xf32>
    %cst_163 = arith.constant dense<0.000000e+00> : vector<16xf32>
    %472 = vector.multi_reduction <add>, %471, %cst_163 [1] : vector<16x32xf32> to vector<16xf32>
    %473 = vector.shape_cast %472 : vector<16xf32> to vector<16x1xf32>
    %cst_164 = arith.constant 3.200000e+01 : f32
    %474 = vector.broadcast %cst_164 : f32 to vector<16x1xf32>
    %475 = arith.divf %473, %474 : vector<16x1xf32>
    %476 = vector.broadcast %468 : vector<16x1xf32> to vector<16x32xf32>
    %477 = arith.subf %460, %476 : vector<16x32xf32>
    %cst_165 = arith.constant 9.99999974E-6 : f32
    %478 = vector.broadcast %cst_165 : f32 to vector<16x1xf32>
    %479 = arith.addf %475, %478 : vector<16x1xf32>
    %480 = math.rsqrt %479 : vector<16x1xf32>
    %481 = vector.broadcast %480 : vector<16x1xf32> to vector<16x32xf32>
    %482 = arith.mulf %477, %481 : vector<16x32xf32>
    %483 = vector.broadcast %462 : vector<1x32xf32> to vector<16x32xf32>
    %484 = arith.mulf %482, %483 : vector<16x32xf32>
    %485 = vector.broadcast %464 : vector<1x32xf32> to vector<16x32xf32>
    %486 = arith.addf %484, %485 : vector<16x32xf32>
    %487 = vector.extract_strided_slice %486 {offsets = [0, 0], sizes = [1, 32], strides = [1, 1]} : vector<16x32xf32> to vector<1x32xf32>
    %488 = vector.extract_strided_slice %486 {offsets = [8, 0], sizes = [1, 32], strides = [1, 1]} : vector<16x32xf32> to vector<1x32xf32>
    %489 = tpu.concatenate %487, %488 in 0 : vector<1x32xf32>, vector<1x32xf32> -> vector<2x32xf32>
    %c0_166 = arith.constant 0 : index
    %c0_167 = arith.constant 0 : index
    %490 = vector.load %arg17[%c0_166, %c0_167] : memref<32x128xf32, #tpu.memory_space<vmem>>, vector<32x128xf32>
    %cst_168 = arith.constant dense<0.000000e+00> : vector<2x128xf32>
    %491 = tpu.matmul %489, %490, %cst_168 {dimension_numbers = #tpu.dot_dimension_numbers<[1], [0], [0], [1], [0, 0, 1, 1], [], []>} : vector<2x32xf32>, vector<32x128xf32>, vector<2x128xf32> -> vector<2x128xf32>
    %c0_169 = arith.constant 0 : index
    %c0_170 = arith.constant 0 : index
    %492 = vector.load %arg18[%c0_169, %c0_170] : memref<1x128xf32, #tpu.memory_space<vmem>>, vector<1x128xf32>
    %493 = vector.broadcast %492 : vector<1x128xf32> to vector<2x128xf32>
    %494 = arith.addf %491, %493 : vector<2x128xf32>
    %c0_171 = arith.constant 0 : index
    %c0_172 = arith.constant 0 : index
    %495 = vector.load %arg19[%c0_171, %c0_172] : memref<2x128xf32, #tpu.memory_space<vmem>>, vector<2x128xf32>
    tpu.vector_store %arg19[%c0_171, %c0_172], %494 {strides = array<i32>} : memref<2x128xf32, #tpu.memory_space<vmem>>, vector<2x128xf32>,
    return
  }
  func.func @transform_0(%arg0: i32) -> (i32, i32) {
    %c0_i32 = arith.constant 0 : i32
    %c0_i32_0 = arith.constant 0 : i32
    %c0_i32_1 = arith.constant 0 : i32
    return %c0_i32, %c0_i32_0 : i32, i32
  }
  func.func @transform_1(%arg0: i32) -> (i32, i32, i32) {
    %c0_i32 = arith.constant 0 : i32
    %c0_i32_0 = arith.constant 0 : i32
    %c0_i32_1 = arith.constant 0 : i32
    %c0_i32_2 = arith.constant 0 : i32
    return %c0_i32, %c0_i32_0, %c0_i32_1 : i32, i32, i32
  }
  func.func @transform_2(%arg0: i32) -> (i32, i32) {
    %c0_i32 = arith.constant 0 : i32
    %c0_i32_0 = arith.constant 0 : i32
    %c0_i32_1 = arith.constant 0 : i32
    return %c0_i32, %c0_i32_0 : i32, i32
  }
  func.func @transform_3(%arg0: i32) -> (i32, i32) {
    %c0_i32 = arith.constant 0 : i32
    %c0_i32_0 = arith.constant 0 : i32
    %c0_i32_1 = arith.constant 0 : i32
    return %c0_i32, %c0_i32_0 : i32, i32
  }
  func.func @transform_4(%arg0: i32) -> (i32, i32, i32) {
    %c0_i32 = arith.constant 0 : i32
    %c0_i32_0 = arith.constant 0 : i32
    %c0_i32_1 = arith.constant 0 : i32
    %c0_i32_2 = arith.constant 0 : i32
    return %c0_i32, %c0_i32_0, %c0_i32_1 : i32, i32, i32
  }
  func.func @transform_5(%arg0: i32) -> (i32, i32, i32) {
    %c0_i32 = arith.constant 0 : i32
    %c0_i32_0 = arith.constant 0 : i32
    %c0_i32_1 = arith.constant 0 : i32
    %c0_i32_2 = arith.constant 0 : i32
    return %c0_i32, %c0_i32_0, %c0_i32_1 : i32, i32, i32
  }
  func.func @transform_6(%arg0: i32) -> (i32, i32, i32) {
    %c0_i32 = arith.constant 0 : i32
    %c0_i32_0 = arith.constant 0 : i32
    %c0_i32_1 = arith.constant 0 : i32
    %c0_i32_2 = arith.constant 0 : i32
    return %c0_i32, %c0_i32_0, %c0_i32_1 : i32, i32, i32
  }
  func.func @transform_7(%arg0: i32) -> (i32, i32, i32) {
    %c0_i32 = arith.constant 0 : i32
    %c0_i32_0 = arith.constant 0 : i32
    %c0_i32_1 = arith.constant 0 : i32
    %c0_i32_2 = arith.constant 0 : i32
    return %c0_i32, %c0_i32_0, %c0_i32_1 : i32, i32, i32
  }
  func.func @transform_8(%arg0: i32) -> (i32, i32, i32) {
    %c0_i32 = arith.constant 0 : i32
    %c0_i32_0 = arith.constant 0 : i32
    %c0_i32_1 = arith.constant 0 : i32
    %c0_i32_2 = arith.constant 0 : i32
    return %c0_i32, %c0_i32_0, %c0_i32_1 : i32, i32, i32
  }
  func.func @transform_9(%arg0: i32) -> (i32, i32, i32) {
    %c0_i32 = arith.constant 0 : i32
    %c0_i32_0 = arith.constant 0 : i32
    %c0_i32_1 = arith.constant 0 : i32
    %c0_i32_2 = arith.constant 0 : i32
    return %c0_i32, %c0_i32_0, %c0_i32_1 : i32, i32, i32
  }
  func.func @transform_10(%arg0: i32) -> (i32, i32, i32) {
    %c0_i32 = arith.constant 0 : i32
    %c0_i32_0 = arith.constant 0 : i32
    %c0_i32_1 = arith.constant 0 : i32
    %c0_i32_2 = arith.constant 0 : i32
    return %c0_i32, %c0_i32_0, %c0_i32_1 : i32, i32, i32
  }
  func.func @transform_11(%arg0: i32) -> (i32, i32, i32) {
    %c0_i32 = arith.constant 0 : i32
    %c0_i32_0 = arith.constant 0 : i32
    %c0_i32_1 = arith.constant 0 : i32
    %c0_i32_2 = arith.constant 0 : i32
    return %c0_i32, %c0_i32_0, %c0_i32_1 : i32, i32, i32
  }
  func.func @transform_12(%arg0: i32) -> (i32, i32, i32) {
    %c0_i32 = arith.constant 0 : i32
    %c0_i32_0 = arith.constant 0 : i32
    %c0_i32_1 = arith.constant 0 : i32
    %c0_i32_2 = arith.constant 0 : i32
    return %c0_i32, %c0_i32_0, %c0_i32_1 : i32, i32, i32
  }
  func.func @transform_13(%arg0: i32) -> (i32, i32, i32) {
    %c0_i32 = arith.constant 0 : i32
    %c0_i32_0 = arith.constant 0 : i32
    %c0_i32_1 = arith.constant 0 : i32
    %c0_i32_2 = arith.constant 0 : i32
    return %c0_i32, %c0_i32_0, %c0_i32_1 : i32, i32, i32
  }
  func.func @transform_14(%arg0: i32) -> (i32, i32, i32) {
    %c0_i32 = arith.constant 0 : i32
    %c0_i32_0 = arith.constant 0 : i32
    %c0_i32_1 = arith.constant 0 : i32
    %c0_i32_2 = arith.constant 0 : i32
    return %c0_i32, %c0_i32_0, %c0_i32_1 : i32, i32, i32
  }
  func.func @transform_15(%arg0: i32) -> (i32, i32, i32) {
    %c0_i32 = arith.constant 0 : i32
    %c0_i32_0 = arith.constant 0 : i32
    %c0_i32_1 = arith.constant 0 : i32
    %c0_i32_2 = arith.constant 0 : i32
    return %c0_i32, %c0_i32_0, %c0_i32_1 : i32, i32, i32
  }
  func.func @transform_16(%arg0: i32) -> (i32, i32) {
    %c0_i32 = arith.constant 0 : i32
    %c0_i32_0 = arith.constant 0 : i32
    %c0_i32_1 = arith.constant 0 : i32
    return %c0_i32, %c0_i32_0 : i32, i32
  }
  func.func @transform_17(%arg0: i32) -> (i32, i32) {
    %c0_i32 = arith.constant 0 : i32
    %c0_i32_0 = arith.constant 0 : i32
    %c0_i32_1 = arith.constant 0 : i32
    return %c0_i32, %c0_i32_0 : i32, i32
  }
  func.func @transform_18(%arg0: i32) -> (i32, i32) {
    %c0_i32 = arith.constant 0 : i32
    %c0_i32_0 = arith.constant 0 : i32
    %c0_i32_1 = arith.constant 0 : i32
    return %c0_i32, %c0_i32_0 : i32, i32
  }
}

</mosaic_0001>

<bundles_post_ra>
// kernel: forward.1
= control target key start
LH: loop header
LB: loop body
LE: loop exit
PB: predicated region body
PF: predicated region fallthrough
CT: control target
= control target key end

     0   :  { %vm63_vm0 = vcmask 261120   ;;  %v2240_v2 = vmov 32.0   ;;  %s2242_s20 = smov 104   ;;  %s2934_s21 = smov 120   ;;  %vm175_vm5 = vcmask 64512   ;;  %vm439_vm9 = vcmask 130048   ;;  %s2914_s0 = inlined_call_operand.vmem [shape: f32[16,32], index: 0, kind: input, shape index: {}]   ;;  %s2915_s2 = inlined_call_operand.vmem [shape: f32[1,32], index: 2, kind: input, shape index: {}]   ;;  %s2916_s3 = inlined_call_operand.vmem [shape: f32[1,32], index: 3, kind: input, shape index: {}]   ;;  %s2917_s5 = inlined_call_operand.vmem [shape: f32[2,1,96], index: 5, kind: input, shape index: {}]   ;;  %s2918_s4 = inlined_call_operand.vmem [shape: f32[2,32,96], index: 4, kind: input, shape index: {}]   ;;  %s2919_s1 = inlined_call_operand.vmem [shape: f32[2,1,8], index: 1, kind: input, shape index: {}]   ;;  %s2920_s6 = inlined_call_operand.vmem [shape: f32[2,32,32], index: 6, kind: input, shape index: {}]   ;;  %s2921_s7 = inlined_call_operand.vmem [shape: f32[2,1,32], index: 7, kind: input, shape index: {}]   ;;  %s2922_s8 = inlined_call_operand.vmem [shape: f32[2,1,32], index: 8, kind: input, shape index: {}]   ;;  %s2923_s9 = inlined_call_operand.vmem [shape: f32[2,1,32], index: 9, kind: input, shape index: {}]   ;;  %s2924_s10 = inlined_call_operand.vmem [shape: f32[2,32,64], index: 10, kind: input, shape index: {}]   ;;  %s2925_s11 = inlined_call_operand.vmem [shape: f32[2,1,64], index: 11, kind: input, shape index: {}]   ;;  %s2926_s13 = inlined_call_operand.vmem [shape: f32[2,1,32], index: 13, kind: input, shape index: {}]   ;;  %s2927_s12 = inlined_call_operand.vmem [shape: f32[2,64,32], index: 12, kind: input, shape index: {}]   ;;  %s2928_s14 = inlined_call_operand.vmem [shape: f32[2,1,32], index: 14, kind: input, shape index: {}]   ;;  %s2929_s15 = inlined_call_operand.vmem [shape: f32[2,1,32], index: 15, kind: input, shape index: {}]   ;;  %s2930_s17 = inlined_call_operand.vmem [shape: f32[1,128], index: 17, kind: input, shape index: {}]   ;;  %s2931_s16 = inlined_call_operand.vmem [shape: f32[32,128], index: 16, kind: input, shape index: {}]   ;;  %s2932_s18 = inlined_call_operand.vmem [shape: f32[2,128], index: 18, kind: output, shape index: {}]  }
   0x1   :  { %2936 = sst [smem:[#allocation2_spill]] %s2914_s0  ;;  %2138 = vrcp.f32 %v2240_v2  ;;  %v128_v14 = vld [vmem:[%s2918_s4 + $0x18] sm:$0xff]  ;;  %v127_v15 = vld [vmem:[%s2918_s4 + $0x10] sm:$0xff]  ;;  %v126_v16 = vld [vmem:[%s2918_s4 + $0x8] sm:$0xff]  ;;  %s2244_s22 = smov 96   ;;  %vm441_vm10 = vcmask 195584  }
   0x2   :  { %2937 = sst [smem:[#allocation3_spill]] %s2915_s2  ;;  %151 = vmatpush.msra.mxu0 %v128_v14  ;;  %v125_v17 = vld [vmem:[%s2918_s4] sm:$0xff]  ;;  %s2241_s2 = smov 112  }
   0x3   :  { %2938 = sst [smem:[#allocation4_spill]] %s2916_s3  ;;  %v2385_v35 = vld [vmem:[%s2917_s5] ss:$0 sm:$0xff]  ;;  %s2245_s3 = smov 64  }
   0x4   :  { %s2939_s29 = sld [smem:[#allocation2_spill]]  ;;  %152 = vmatpush.msra.mxu0 %v127_v15  ;;  %s2247_s28 = smov 8  }
   0x5   :  { %s2940_s27 = sld [smem:[#allocation3_spill]] }
   0x6   :  { %153 = vmatpush.msra.mxu0 %v126_v16  ;;  %s2941_s30 = sld [smem:[#allocation4_spill]] }
   0x7   :  { %v2139_v3 = vpop.eup %2138 }
   0x8   :  { %v71_v4 = vmul.f32 32.0, %v2139_v3  ;;  %vm75_vm1 = vweird.f32 %v2139_v3  ;;  %154 = vmatpush.msra.mxu0 %v125_v17 }
   0xa   :  { %v59_v0 = vld [vmem:[%s2939_s29] sm:$0xff]  ;;  %v72_v5 = vsub.f32 1.0, %v71_v4  ;;  %v60_v18 = vld [vmem:[%s2939_s29 + $0x8] sm:$0xff]  ;;  %s2248_s29 = smov 16  }
   0xb   :  { %v64_v1 = vsel %vm63_vm0, %v59_v0, 0.0  ;;  %v67_v19 = vsel %vm63_vm0, %v60_v18, 0.0  ;;  %v2372_v29 = vld [vmem:[%s2940_s27] ss:$0 sm:$0xff]  ;;  %s2246_s27 = smov 24  }
   0xc   :  { %65 = vadd.xlane.f32.xlu0 %v64_v1  ;;  %v73_v6 = vmul.f32 %v2139_v3, %v72_v5  ;;  %68 = vadd.xlane.f32.xlu2 %v67_v19  ;;  %v2116_v32 = vld [vmem:[%s2941_s30] ss:$0 sm:$0xff] }
   0xe   :  { %v74_v7 = vadd.f32 %v2139_v3, %v73_v6 }
  0x10   :  { %v2348_v8 = vsel %vm75_vm1, %v2139_v3, %v74_v7 }
  0x7f   :  { %v66_v9 = vpop.xlane.xlu0 %65  ;;  %v69_v38 = vpop.xlane.xlu2 %68 }
  0x80   :  { %v77_v10 = vmul.f32 %v2348_v8, %v66_v9  ;;  %v78_v42 = vmul.f32 %v2348_v8, %v69_v38 }
  0x82   :  { %v79_v11 = vsub.f32 %v59_v0, %v77_v10  ;;  %v80_v43 = vsub.f32 %v60_v18, %v78_v42  ;;  %v2118_v0 = vld [vmem:[%s2919_s1] ss:$0 sm:$0xff] }
  0x84   :  { %v81_v12 = vmul.f32 %v79_v11, %v79_v11  ;;  %v82_v44 = vmul.f32 %v80_v43, %v80_v43 }
  0x86   :  { %v83_v13 = vsel %vm63_vm0, %v81_v12, 0.0  ;;  %v86_v45 = vsel %vm63_vm0, %v82_v44, 0.0 }
  0x87   :  { %84 = vadd.xlane.f32.xlu0 %v83_v13 }
  0xfa   :  { %v85_v20 = vpop.xlane.xlu0 %84 }
  0xfb   :  { %v89_v21 = vmul.f32 %v85_v20, %v2348_v8 }
  0xfd   :  { %v91_v22 = vadd.f32 1e-05, %v89_v21 }
  0xff   :  { %2140 = vrsqrt.f32 %v91_v22  ;;  %vm99_vm3 = vweird.f32 %v91_v22 }
 0x105   :  { %v2141_v23 = vpop.eup %2140 }
 0x106   :  { %v94_v24 = vmul.f32 %v2141_v23, %v91_v22  ;;  %vm100_vm2 = vweird.f32 %v2141_v23 }
 0x107   :  { %vm101_vm4 = vmor %vm99_vm3, %vm100_vm2 }
 0x108   :  { %v95_v25 = vmul.f32 %v2141_v23, %v94_v24 }
 0x10a   :  { %v96_v26 = vmul.f32 0.5, %v95_v25 }
 0x10c   :  { %v97_v27 = vsub.f32 1.5, %v96_v26 }
 0x10e   :  { %v98_v28 = vmul.f32 %v2141_v23, %v97_v27 }
 0x110   :  { %v102_v30 = vsel %vm101_vm4, %v2141_v23, %v98_v28  ;;  %vm946_vm4 = vcmask 523264  }
 0x111   :  { %v113_v31 = vmul.f32 %v102_v30, %v79_v11 }
 0x113   :  { %v118_v33 = vmul.f32 %v2372_v29, %v113_v31 }
 0x115   :  { %v2378_v34 = vadd.f32 %v2116_v32, %v118_v33 }
 0x117   :  { %1991 = vmatmul.msk.f32.vlgmr.msra.gmra.mxu0 %vm63_vm0, %v2378_v34 }
 0x194   :  { %v156_v36 = vpop.f32.mrf.mxu0 }
 0x195   :  { %v2388_v37 = vadd.f32 %v2385_v35, %v156_v36 }
 0x197   :  { %165 = vrot.lane.b32.xlu0 %v2388_v37, %s2241_s2  ;;  %167 = vrot.lane.b32.xlu2 %v2388_v37, %s2242_s20 }
 0x198   :  { %163 = vrot.lane.b32.xlu1 %v2388_v37, %s2934_s21 }
 0x1f1   :  { %v2396_v39 = vpop.permute.xlu2 %167 }
 0x1f2   :  { %252 = vrot.lane.b32.xlu2 %v2396_v39, %s2244_s22  ;;  %v2095_v21 = vpack.i.bf16 %v2396_v39, %v2388_v37 }
 0x209   :  { %v2400_v40 = vpop.permute.xlu0 %165 }
 0x20a   :  { %v164_v41 = vpop.permute.xlu1 %163  ;;  %226 = vrot.lane.b32.xlu0 %v2400_v40, %s2244_s22 }
 0x20b   :  { %200 = vrot.lane.b32.xlu1 %v164_v41, %s2244_s22 }
 0x213   :  { %173 = vrot.lane.b32.xlu1 %v2388_v37, %s2244_s22 }
 0x23d   :  { %87 = vadd.xlane.f32.xlu1 %v86_v45 }
 0x24c   :  { %v253_v49 = vpop.permute.xlu2 %252 }
 0x256   :  { %348 = vrot.lane.b32.xlu1 %v164_v41, %s2245_s3 }
 0x27c   :  { %v227_v46 = vpop.permute.xlu0 %226 }
 0x27d   :  { %v201_v47 = vpop.permute.xlu1 %200 }
 0x27e   :  { %1995 = vmatpush.xpose.msk.msra.mxu3 %vm175_vm5, %v201_v47 }
 0x281   :  { %1996 = vmatmul.msk.f32.vlgmr.msra.gmra.mxu3 %vm175_vm5, %v164_v41 }
 0x282   :  { %1997 = vmatpush.xpose.msk.msrb.mxu3 %vm175_vm5, %v227_v46 }
 0x285   :  { %v174_v48 = vpop.permute.xlu1 %173 }
 0x286   :  { %1993 = vmatpush.xpose.msk.msra.mxu1 %vm175_vm5, %v174_v48 }
 0x289   :  { %1994 = vmatmul.msk.f32.vlgmr.msra.gmra.mxu1 %vm175_vm5, %v2388_v37  ;;  %1998 = vmatmul.msk.f32.vlgmr.msrb.gmra.mxu3 %vm175_vm5, %v2400_v40 }
 0x28a   :  { %1999 = vmatpush.xpose.msk.msrb.mxu1 %vm175_vm5, %v253_v49 }
 0x291   :  { %2000 = vmatmul.msk.f32.vlgmr.msrb.gmra.mxu1 %vm175_vm5, %v2396_v39 }
 0x2b0   :  { %v88_v50 = vpop.xlane.xlu1 %87 }
 0x2b1   :  { %v90_v51 = vmul.f32 %v88_v50, %v2348_v8 }
 0x2b3   :  { %v92_v52 = vadd.f32 1e-05, %v90_v51 }
 0x2b5   :  { %2142 = vrsqrt.f32 %v92_v52  ;;  %vm109_vm7 = vweird.f32 %v92_v52 }
 0x2bb   :  { %v2143_v53 = vpop.eup %2142 }
 0x2bc   :  { %v104_v54 = vmul.f32 %v2143_v53, %v92_v52  ;;  %vm110_vm6 = vweird.f32 %v2143_v53 }
 0x2bd   :  { %vm111_vm8 = vmor %vm109_vm7, %vm110_vm6 }
 0x2be   :  { %v105_v55 = vmul.f32 %v2143_v53, %v104_v54 }
 0x2c0   :  { %v106_v56 = vmul.f32 0.5, %v105_v55 }
 0x2c2   :  { %v107_v57 = vsub.f32 1.5, %v106_v56 }
 0x2c4   :  { %v108_v58 = vmul.f32 %v2143_v53, %v107_v57 }
 0x2c6   :  { %v112_v59 = vsel %vm111_vm8, %v2143_v53, %v108_v58 }
 0x2c7   :  { %v114_v60 = vmul.f32 %v112_v59, %v80_v43 }
 0x2c8   :  { %v349_v61 = vpop.permute.xlu1 %348 }
 0x2c9   :  { %369 = vmatpush.msra.mxu3 %v349_v61  ;;  %v119_v62 = vmul.f32 %v2372_v29, %v114_v60 }
 0x2cb   :  { %v2423_v63 = vadd.f32 %v2116_v32, %v119_v62  ;;  %v2119_v62 = vld [vmem:[%s2919_s1 + $0x1] ss:$0 sm:$0xff] }
 0x2cd   :  { %1992 = vmatmul.msk.f32.gmra.mxu0 %vm63_vm0, %v2423_v63 }
 0x304   :  { %v223_v1 = vpop.f32.mrf.mxu3 }
 0x305   :  { %v224_v2 = vadd.f32 %v2118_v0, %v223_v1 }
 0x306   :  { %v197_v3 = vpop.f32.mrf.mxu1 }
 0x307   :  { %v198_v4 = vadd.f32 %v2118_v0, %v197_v3  ;;  %v281_v5 = vsel %vm175_vm5, %v224_v2, -inf }
 0x308   :  { %282 = vmax.xlane.f32.xlu2 %v281_v5 }
 0x309   :  { %v278_v15 = vsel %vm175_vm5, %v198_v4, -inf }
 0x30c   :  { %v249_v6 = vpop.f32.mrf.mxu3 }
 0x30d   :  { %v250_v7 = vadd.f32 %v2118_v0, %v249_v6 }
 0x30e   :  { %v275_v9 = vpop.f32.mrf.mxu1 }
 0x30f   :  { %v276_v10 = vadd.f32 %v2118_v0, %v275_v9  ;;  %v284_v11 = vsel %vm175_vm5, %v250_v7, -inf }
 0x310   :  { %285 = vmax.xlane.f32.xlu2 %v284_v11 }
 0x311   :  { %v287_v12 = vsel %vm175_vm5, %v276_v10, -inf }
 0x312   :  { %288 = vmax.xlane.f32.xlu1 %v287_v12 }
 0x34a   :  { %v159_v13 = vpop.f32.mrf.mxu0 }
 0x34b   :  { %v2434_v14 = vadd.f32 %v2385_v35, %v159_v13 }
 0x34d   :  { %446 = vrot.lane.b32.xlu1 %v2434_v14, %s2241_s2  ;;  %448 = vrot.lane.b32.xlu2 %v2434_v14, %s2242_s20 }
 0x34e   :  { %455 = vrot.lane.b32.xlu0 %v2434_v14, %s2244_s22 }
 0x378   :  { %279 = vmax.xlane.f32.xlu0 %v278_v15 }
 0x37b   :  { %v283_v16 = vpop.xlane.xlu2 %282 }
 0x37c   :  { %v291_v17 = vsub.f32 %v224_v2, %v283_v16 }
 0x37e   :  { %v296_v18 = vmul.f32 1.442695, %v291_v17 }
 0x380   :  { %2144 = vpow2.f32 %v296_v18 }
 0x383   :  { %v286_v27 = vpop.xlane.xlu2 %285 }
 0x384   :  { %v292_v28 = vsub.f32 %v250_v7, %v286_v27 }
 0x385   :  { %v289_v22 = vpop.xlane.xlu1 %288 }
 0x386   :  { %v2145_v19 = vpop.eup %2144  ;;  %v293_v23 = vsub.f32 %v276_v10, %v289_v22  ;;  %v298_v29 = vmul.f32 1.442695, %v292_v28 }
 0x387   :  { %v305_v20 = vsel %vm175_vm5, %v2145_v19, 0.0 }
 0x388   :  { %306 = vadd.xlane.f32.xlu1 %v305_v20  ;;  %v300_v24 = vmul.f32 1.442695, %v293_v23 }
 0x38a   :  { %2146 = vpow2.f32 %v300_v24 }
 0x38b   :  { %2148 = vpow2.f32 %v298_v29 }
 0x38c   :  { %444 = vrot.lane.b32.xlu0 %v2434_v14, %s2934_s21 }
 0x390   :  { %v2147_v25 = vpop.eup %2146 }
 0x391   :  { %v311_v26 = vsel %vm175_vm5, %v2147_v25, 0.0  ;;  %v2149_v31 = vpop.eup %2148 }
 0x392   :  { %v308_v32 = vsel %vm175_vm5, %v2149_v31, 0.0 }
 0x3a1   :  { %2096 = vrot.lane.b32.xlu1 %v2095_v21, %s2245_s3 }
 0x3a7   :  { %v2466_v44 = vpop.permute.xlu2 %448 }
 0x3b6   :  { %312 = vadd.xlane.f32.xlu0 %v311_v26 }
 0x3bf   :  { %v2454_v33 = vpop.permute.xlu1 %446 }
 0x3c0   :  { %v456_v30 = vpop.permute.xlu0 %455 }
 0x3c1   :  { %2006 = vmatpush.xpose.msk.msrb.mxu3 %vm175_vm5, %v456_v30  ;;  %v725_v30 = vld [vmem:[%s2920_s6 + $0x18] sm:$0xff] }
 0x3ca   :  { %374 = vrot.lane.b32.xlu0 %v2400_v40, %s2245_s3 }
 0x3cb   :  { %309 = vadd.xlane.f32.xlu1 %v308_v32  ;;  %v723_v32 = vld [vmem:[%s2920_s6 + $0x8] sm:$0xff] }
 0x3d2   :  { %507 = vrot.lane.b32.xlu0 %v2454_v33, %s2244_s22 }
 0x3eb   :  { %v280_v35 = vpop.xlane.xlu0 %279 }
 0x3ec   :  { %v290_v36 = vsub.f32 %v198_v4, %v280_v35 }
 0x3ee   :  { %v294_v37 = vmul.f32 1.442695, %v290_v36 }
 0x3f0   :  { %2150 = vpow2.f32 %v294_v37  ;;  %v722_v37 = vld [vmem:[%s2920_s6] sm:$0xff] }
 0x3f6   :  { %v2151_v38 = vpop.eup %2150 }
 0x3f7   :  { %v302_v39 = vsel %vm175_vm5, %v2151_v38, 0.0 }
 0x3f8   :  { %303 = vadd.xlane.f32.xlu2 %v302_v39 }
 0x3fb   :  { %v307_v41 = vpop.xlane.xlu1 %306 }
 0x3fc   :  { %2152 = vrcp.f32 %v307_v41 }
 0x3fe   :  { %v2459_v42 = vpop.permute.xlu0 %444 }
 0x3ff   :  { %481 = vrot.lane.b32.xlu1 %v2459_v42, %s2244_s22 }
 0x402   :  { %v2153_v40 = vpop.eup %2152 }
 0x403   :  { %v319_v43 = vmul.f32 %v2153_v40, %v2145_v19 }
 0x405   :  { %2002 = vmatmul.msk.f32.vlgmr.msra.gmra.mxu3 %vm175_vm5, %v319_v43 }
 0x40d   :  { %2007 = vmatmul.msk.f32.vlgmr.msrb.gmra.mxu3 %vm175_vm5, %v2434_v14 }
 0x410   :  { %533 = vrot.lane.b32.xlu2 %v2466_v44, %s2244_s22 }
 0x413   :  { %v2097_v45 = vpop.permute.xlu1 %2096 }
 0x414   :  { %v2098_v46 = vunpack.i.l.bf16 %v2097_v45  ;;  %v2099_v47 = vunpack.i.h.bf16 %v2097_v45 }
 0x416   :  { %343 = vmatpush.msra.mxu2 %v2098_v46 }
 0x418   :  { %421 = vmatpush.msrb.mxu2 %v2099_v47 }
 0x429   :  { %v313_v48 = vpop.xlane.xlu0 %312 }
 0x43c   :  { %v375_v49 = vpop.permute.xlu0 %374 }
 0x43d   :  { %395 = vmatpush.msra.mxu1 %v375_v49 }
 0x43e   :  { %v310_v50 = vpop.xlane.xlu1 %309 }
 0x43f   :  { %2154 = vrcp.f32 %v310_v50 }
 0x444   :  { %v508_v51 = vpop.permute.xlu0 %507 }
 0x445   :  { %v2155_v52 = vpop.eup %2154  ;;  %2010 = vmatpush.xpose.msk.msrb.mxu1 %vm175_vm5, %v508_v51 }
 0x446   :  { %v320_v53 = vmul.f32 %v2155_v52, %v2149_v31  ;;  %v724_v31 = vld [vmem:[%s2920_s6 + $0x10] sm:$0xff] }
 0x448   :  { %2003 = vmatmul.msk.f32.vlgmr.msra.gmra.mxu1 %vm175_vm5, %v320_v53 }
 0x450   :  { %2011 = vmatmul.msk.f32.vlgmr.msrb.gmra.mxu1 %vm175_vm5, %v2454_v33 }
 0x46b   :  { %v304_v54 = vpop.xlane.xlu2 %303 }
 0x46c   :  { %2156 = vrcp.f32 %v304_v54  ;;  %v2100_v54 = vpack.i.bf16 %v2459_v42, %v2466_v44 }
 0x46d   :  { %2158 = vrcp.f32 %v313_v48 }
 0x471   :  { %v482_v55 = vpop.permute.xlu1 %481 }
 0x472   :  { %v2157_v56 = vpop.eup %2156  ;;  %2008 = vmatpush.xpose.msk.msrb.mxu0 %vm175_vm5, %v482_v55 }
 0x473   :  { %v534_v57 = vpop.permute.xlu2 %533  ;;  %v318_v58 = vmul.f32 %v2157_v56, %v2151_v38  ;;  %v2159_v59 = vpop.eup %2158 }
 0x474   :  { %v321_v60 = vmul.f32 %v2159_v59, %v2147_v25 }
 0x475   :  { %2001 = vmatmul.msk.f32.vlgmr.msra.gmra.mxu2 %vm175_vm5, %v318_v58  ;;  %2009 = vmatmul.msk.f32.vlgmr.msrb.gmra.mxu0 %vm175_vm5, %v2459_v42 }
 0x476   :  { %2012 = vmatpush.xpose.msk.msra.mxu2 %vm175_vm5, %v534_v57 }
 0x47d   :  { %2004 = vmatmul.msk.f32.vlgmr.msrb.gmra.mxu2 %vm175_vm5, %v321_v60 }
 0x485   :  { %2013 = vmatmul.msk.f32.vlgmr.msra.gmra.mxu2 %vm175_vm5, %v2466_v44 }
 0x488   :  { %v371_v61 = vpop.f32.mrf.mxu3 }
 0x490   :  { %v478_v0 = vpop.f32.mrf.mxu3 }
 0x491   :  { %v479_v1 = vadd.f32 %v2119_v62, %v478_v0 }
 0x493   :  { %v559_v2 = vsel %vm175_vm5, %v479_v1, -inf }
 0x494   :  { %560 = vmax.xlane.f32.xlu2 %v559_v2 }
 0x4ac   :  { %603 = vrot.lane.b32.xlu2 %v2434_v14, %s2245_s3 }
 0x4c5   :  { %v397_v3 = vpop.f32.mrf.mxu1 }
 0x4cd   :  { %v530_v4 = vpop.f32.mrf.mxu1 }
 0x4ce   :  { %v531_v5 = vadd.f32 %v2119_v62, %v530_v4 }
 0x4d0   :  { %v565_v6 = vsel %vm175_vm5, %v531_v5, -inf }
 0x4d5   :  { %566 = vmax.xlane.f32.xlu2 %v565_v6 }
 0x4f2   :  { %v504_v7 = vpop.f32.mrf.mxu0 }
 0x4f3   :  { %v505_v9 = vadd.f32 %v2119_v62, %v504_v7 }
 0x4f5   :  { %v562_v10 = vsel %vm175_vm5, %v505_v9, -inf }
 0x4f6   :  { %563 = vmax.xlane.f32.xlu1 %v562_v10 }
 0x4f8   :  { %v345_v11 = vpop.f32.mrf.mxu2 }
 0x500   :  { %v423_v12 = vpop.f32.mrf.mxu2 }
 0x501   :  { %435 = vrot.lane.b32.xlu2 %v423_v12, %s2246_s27 }
 0x507   :  { %v561_v13 = vpop.xlane.xlu2 %560 }
 0x508   :  { %v571_v15 = vsub.f32 %v479_v1, %v561_v13  ;;  %v556_v16 = vpop.f32.mrf.mxu2 }
 0x509   :  { %v557_v14 = vadd.f32 %v2119_v62, %v556_v16 }
 0x50a   :  { %v575_v17 = vmul.f32 1.442695, %v571_v15 }
 0x50b   :  { %v568_v18 = vsel %vm175_vm5, %v557_v14, -inf }
 0x50c   :  { %2160 = vpow2.f32 %v575_v17  ;;  %569 = vmax.xlane.f32.xlu0 %v568_v18 }
 0x50f   :  { %427 = vrot.lane.b32.xlu1 %v371_v61, %s2247_s28  ;;  %v604_v19 = vpop.permute.xlu2 %603 }
 0x510   :  { %624 = vmatpush.msra.mxu3 %v604_v19  ;;  %v820_v19 = vld [vmem:[%s2924_s10 + $0x18] sm:$0xff] }
 0x512   :  { %v2161_v20 = vpop.eup %2160  ;;  %748 = vmatpush.msrb.mxu3 %v725_v30 }
 0x513   :  { %v583_v21 = vsel %vm175_vm5, %v2161_v20, 0.0 }
 0x514   :  { %584 = vadd.xlane.f32.xlu0 %v583_v21  ;;  %749 = vmatpush.msrb.mxu3 %v724_v31 }
 0x516   :  { %750 = vmatpush.msrb.mxu3 %v723_v32 }
 0x518   :  { %751 = vmatpush.msrb.mxu3 %v722_v37  ;;  %v2553_v37 = vld [vmem:[%s2922_s8] ss:$0 sm:$0xff] }
 0x528   :  { %431 = vrot.lane.b32.xlu0 %v397_v3, %s2248_s29  ;;  %v2120_v3 = vld [vmem:[%s2921_s7] ss:$0 sm:$0xff] }
 0x548   :  { %v567_v22 = vpop.xlane.xlu2 %566 }
 0x549   :  { %v573_v23 = vsub.f32 %v531_v5, %v567_v22 }
 0x54b   :  { %v579_v24 = vmul.f32 1.442695, %v573_v23  ;;  %v819_v23 = vld [vmem:[%s2924_s10 + $0x10] sm:$0xff] }
 0x54d   :  { %2162 = vpow2.f32 %v579_v24  ;;  %v818_v24 = vld [vmem:[%s2924_s10 + $0x8] sm:$0xff] }
 0x553   :  { %v2163_v25 = vpop.eup %2162 }
 0x554   :  { %v589_v26 = vsel %vm175_vm5, %v2163_v25, 0.0 }
 0x555   :  { %590 = vadd.xlane.f32.xlu2 %v589_v26 }
 0x55b   :  { %v436_v51 = vpop.permute.xlu2 %435 }
 0x569   :  { %v564_v27 = vpop.xlane.xlu1 %563 }
 0x56a   :  { %v572_v28 = vsub.f32 %v505_v9, %v564_v27 }
 0x56c   :  { %v577_v29 = vmul.f32 1.442695, %v572_v28 }
 0x56e   :  { %2164 = vpow2.f32 %v577_v29 }
 0x574   :  { %v2165_v35 = vpop.eup %2164 }
 0x575   :  { %v586_v36 = vsel %vm175_vm5, %v2165_v35, 0.0 }
 0x576   :  { %587 = vadd.xlane.f32.xlu1 %v586_v36 }
 0x57f   :  { %v570_v38 = vpop.xlane.xlu0 %569 }
 0x580   :  { %v574_v39 = vsub.f32 %v557_v14, %v570_v38 }
 0x581   :  { %v428_v48 = vpop.permute.xlu1 %427 }
 0x582   :  { %v581_v41 = vmul.f32 1.442695, %v574_v39  ;;  %v438_v49 = vsel %vm175_vm5, %v345_v11, %v428_v48 }
 0x584   :  { %2166 = vpow2.f32 %v581_v41  ;;  %v2558_v41 = vld [vmem:[%s2923_s9] ss:$0 sm:$0xff] }
 0x587   :  { %v585_v40 = vpop.xlane.xlu0 %584 }
 0x588   :  { %2168 = vrcp.f32 %v585_v40 }
 0x58a   :  { %v2167_v43 = vpop.eup %2166 }
 0x58b   :  { %v592_v45 = vsel %vm175_vm5, %v2167_v43, 0.0 }
 0x58c   :  { %593 = vadd.xlane.f32.xlu0 %v592_v45 }
 0x58e   :  { %v2169_v46 = vpop.eup %2168 }
 0x58f   :  { %v599_v47 = vmul.f32 %v2169_v46, %v2161_v20  ;;  %655 = vrot.lane.b32.xlu1 %v2454_v33, %s2245_s3 }
 0x591   :  { %2014 = vmatmul.msk.f32.vlgmr.msra.gmra.mxu3 %vm175_vm5, %v599_v47 }
 0x59a   :  { %v432_v50 = vpop.permute.xlu0 %431 }
 0x59b   :  { %v440_v52 = vsel %vm439_vm9, %v438_v49, %v432_v50  ;;  %v2574_v49 = vld [vmem:[%s2925_s11] ss:$0 sm:$0xff] }
 0x59c   :  { %v442_v53 = vsel %vm441_vm10, %v440_v52, %v436_v51 }
 0x59d   :  { %2018 = vmatmul.msk.f32.vlgmr.msrb.gmra.mxu3 %vm63_vm0, %v442_v53 }
 0x5a0   :  { %2101 = vrot.lane.b32.xlu0 %v2100_v54, %s2245_s3 }
 0x5c8   :  { %v591_v33 = vpop.xlane.xlu2 %590 }
 0x5c9   :  { %2170 = vrcp.f32 %v591_v33 }
 0x5cf   :  { %v2171_v56 = vpop.eup %2170 }
 0x5d0   :  { %v601_v57 = vmul.f32 %v2171_v56, %v2163_v25  ;;  %v817_v25 = vld [vmem:[%s2924_s10] sm:$0xff]  ;;  %v939_v56 = vld [vmem:[%s2927_s12 + $0x28] sm:$0xff] }
 0x5e9   :  { %v588_v55 = vpop.xlane.xlu1 %587 }
 0x5ea   :  { %2172 = vrcp.f32 %v588_v55  ;;  %v940_v55 = vld [vmem:[%s2927_s12 + $0x30] sm:$0xff] }
 0x5f0   :  { %v2173_v60 = vpop.eup %2172 }
 0x5f1   :  { %v600_v42 = vmul.f32 %v2173_v60, %v2165_v35  ;;  %v937_v60 = vld [vmem:[%s2927_s12 + $0x18] sm:$0xff] }
 0x5ff   :  { %v594_v59 = vpop.xlane.xlu0 %593 }
 0x600   :  { %2174 = vrcp.f32 %v594_v59 }
 0x601   :  { %v656_v58 = vpop.permute.xlu1 %655 }
 0x602   :  { %676 = vmatpush.msra.mxu1 %v656_v58  ;;  %v938_v58 = vld [vmem:[%s2927_s12 + $0x20] sm:$0xff] }
 0x603   :  { %2016 = vmatmul.msk.f32.vlgmr.msra.gmra.mxu1 %vm175_vm5, %v601_v57 }
 0x606   :  { %v2175_v61 = vpop.eup %2174 }
 0x607   :  { %v602_v44 = vmul.f32 %v2175_v61, %v2167_v43 }
 0x612   :  { %v2102_v62 = vpop.permute.xlu0 %2101 }
 0x613   :  { %v2104_v0 = vunpack.i.h.bf16 %v2102_v62  ;;  %v2103_v1 = vunpack.i.l.bf16 %v2102_v62 }
 0x614   :  { %v626_v2 = vpop.f32.mrf.mxu3 }
 0x615   :  { %650 = vmatpush.msra.mxu0 %v2104_v0  ;;  %702 = vmatpush.msrb.mxu2 %v2103_v1  ;;  %v936_v0 = vld [vmem:[%s2927_s12 + $0x10] sm:$0xff] }
 0x616   :  { %2015 = vmatmul.msk.f32.vlgmr.msra.gmra.mxu0 %vm175_vm5, %v600_v42  ;;  %2017 = vmatmul.msk.f32.vlgmr.msrb.gmra.mxu2 %vm175_vm5, %v602_v44  ;;  %v935_v44 = vld [vmem:[%s2927_s12 + $0x8] sm:$0xff] }
 0x617   :  { %843 = vmatpush.msrb.mxu0 %v820_v19 }
 0x619   :  { %844 = vmatpush.msrb.mxu0 %v819_v23 }
 0x61b   :  { %845 = vmatpush.msrb.mxu0 %v818_v24 }
 0x61d   :  { %846 = vmatpush.msrb.mxu0 %v817_v25 }
 0x620   :  { %v753_v4 = vpop.f32.mrf.mxu3 }
 0x621   :  { %v754_v5 = vadd.f32 %v2120_v3, %v753_v4 }
 0x623   :  { %v759_v6 = vadd.f32 %v754_v5, %v2378_v34 }
 0x625   :  { %v763_v7 = vsel %vm63_vm0, %v759_v6, 0.0 }
 0x626   :  { %764 = vadd.xlane.f32.xlu2 %v763_v7 }
 0x680   :  { %v678_v9 = vpop.f32.mrf.mxu1 }
 0x681   :  { %712 = vrot.lane.b32.xlu0 %v678_v9, %s2248_s29 }
 0x693   :  { %v652_v10 = vpop.f32.mrf.mxu0 }
 0x694   :  { %708 = vrot.lane.b32.xlu2 %v652_v10, %s2247_s28 }
 0x699   :  { %v704_v11 = vpop.f32.mrf.mxu2  ;;  %v765_v12 = vpop.xlane.xlu2 %764 }
 0x69a   :  { %v769_v13 = vmul.f32 %v765_v12, %v2348_v8  ;;  %716 = vrot.lane.b32.xlu0 %v704_v11, %s2246_s27 }
 0x69c   :  { %v771_v15 = vsub.f32 %v759_v6, %v769_v13 }
 0x69e   :  { %v773_v16 = vmul.f32 %v771_v15, %v771_v15 }
 0x6a0   :  { %v775_v14 = vsel %vm63_vm0, %v773_v16, 0.0 }
 0x6a1   :  { %776 = vadd.xlane.f32.xlu1 %v775_v14 }
 0x6ee   :  { %v709_v17 = vpop.permute.xlu2 %708 }
 0x6ef   :  { %v719_v18 = vsel %vm175_vm5, %v626_v2, %v709_v17  ;;  %v934_v2 = vld [vmem:[%s2927_s12] sm:$0xff] }
 0x6f3   :  { %v713_v34 = vpop.permute.xlu0 %712 }
 0x6f4   :  { %v720_v20 = vsel %vm439_vm9, %v719_v18, %v713_v34 }
 0x70c   :  { %v717_v21 = vpop.permute.xlu0 %716 }
 0x70d   :  { %v721_v22 = vsel %vm441_vm10, %v720_v20, %v717_v21 }
 0x70e   :  { %2019 = vmatmul.msk.f32.gmra.mxu3 %vm63_vm0, %v721_v22 }
 0x714   :  { %v777_v26 = vpop.xlane.xlu1 %776 }
 0x715   :  { %v781_v27 = vmul.f32 %v777_v26, %v2348_v8 }
 0x717   :  { %v783_v28 = vadd.f32 1e-05, %v781_v27 }
 0x719   :  { %2176 = vrsqrt.f32 %v783_v28  ;;  %vm791_vm12 = vweird.f32 %v783_v28 }
 0x71f   :  { %v2177_v29 = vpop.eup %2176 }
 0x720   :  { %v786_v30 = vmul.f32 %v2177_v29, %v783_v28  ;;  %vm792_vm11 = vweird.f32 %v2177_v29 }
 0x721   :  { %vm793_vm13 = vmor %vm791_vm12, %vm792_vm11 }
 0x722   :  { %v787_v31 = vmul.f32 %v2177_v29, %v786_v30 }
 0x724   :  { %v788_v32 = vmul.f32 0.5, %v787_v31 }
 0x726   :  { %v789_v35 = vsub.f32 1.5, %v788_v32  ;;  %v2608_v32 = vld [vmem:[%s2926_s13] ss:$0 sm:$0xff] }
 0x728   :  { %v790_v36 = vmul.f32 %v2177_v29, %v789_v35 }
 0x72a   :  { %v794_v38 = vsel %vm793_vm13, %v2177_v29, %v790_v36 }
 0x72b   :  { %v805_v39 = vmul.f32 %v794_v38, %v771_v15 }
 0x72d   :  { %v810_v40 = vmul.f32 %v2553_v37, %v805_v39 }
 0x72f   :  { %v2562_v43 = vadd.f32 %v2558_v41, %v810_v40 }
 0x731   :  { %2020 = vmatmul.msk.f32.vlgmr.msrb.gmra.mxu0 %vm63_vm0, %v2562_v43 }
 0x791   :  { %v756_v45 = vpop.f32.mrf.mxu3 }
 0x792   :  { %v757_v46 = vadd.f32 %v2120_v3, %v756_v45 }
 0x794   :  { %v2567_v47 = vadd.f32 %v757_v46, %v2423_v63  ;;  %v941_v63 = vld [vmem:[%s2927_s12 + $0x38] sm:$0xff] }
 0x795   :  { %961 = vmatpush.msrb.mxu1 %v941_v63 }
 0x796   :  { %v766_v48 = vsel %vm63_vm0, %v2567_v47, 0.0 }
 0x797   :  { %767 = vadd.xlane.f32.xlu0 %v766_v48  ;;  %962 = vmatpush.msrb.mxu1 %v940_v55 }
 0x799   :  { %963 = vmatpush.msrb.mxu1 %v939_v56 }
 0x79b   :  { %964 = vmatpush.msrb.mxu1 %v938_v58 }
 0x79d   :  { %965 = vmatpush.msrb.mxu1 %v937_v60 }
 0x79f   :  { %966 = vmatpush.msrb.mxu1 %v936_v0 }
 0x7a1   :  { %967 = vmatpush.msrb.mxu1 %v935_v44 }
 0x7a3   :  { %968 = vmatpush.msrb.mxu1 %v934_v2 }
 0x7ae   :  { %v848_v50 = vpop.f32.mrf.mxu0 }
 0x7af   :  { %v849_v51 = vadd.f32 %v2574_v49, %v848_v50 }
 0x7b1   :  { %v856_v52 = vmul.f32 0.70710677, %v849_v51  ;;  %v854_v24 = vmul.f32 0.5, %v849_v51 }
 0x7b3   :  { %v858_v53 = vand.u32 2147483647, %v856_v52  ;;  %vm924_vm3 = vcmp.ge.f32.partialorder %v856_v52, 0.0 }
 0x7b5   :  { %v860_v54 = vmul.f32 0.3275911, %v858_v53  ;;  %v912_v7 = vsub.f32 0.0, %v858_v53 }
 0x7b7   :  { %v862_v33 = vadd.f32 1.0, %v860_v54  ;;  %v914_v11 = vmul.f32 %v912_v7, %v858_v53 }
 0x7b9   :  { %2178 = vrcp.f32 %v862_v33  ;;  %v875_v62 = vand.u32 2147483648, %v862_v33  ;;  %v873_v42 = vand.u32 2147483647, %v862_v33  ;;  %vm869_vm15 = vweird.f32 %v862_v33 }
 0x7ba   :  { %v916_v15 = vmul.f32 1.442695, %v914_v11 }
 0x7bb   :  { %v876_v4 = vor.u32 1.1754944e-38, %v875_v62  ;;  %vm874_vm2 = vcmp.eq.f32.partialorder %v873_v42, 8.507059e+37 }
 0x7bc   :  { %2180 = vpow2.f32 %v916_v15 }
 0x7bf   :  { %v2179_v57 = vpop.eup %2178 }
 0x7c0   :  { %v865_v59 = vmul.f32 %v2179_v57, %v862_v33  ;;  %vm870_vm14 = vweird.f32 %v2179_v57 }
 0x7c1   :  { %vm871_vm1 = vmor %vm869_vm15, %vm870_vm14 }
 0x7c2   :  { %v866_v61 = vsub.f32 1.0, %v865_v59  ;;  %v2181_v19 = vpop.eup %2180 }
 0x7c4   :  { %v867_v1 = vmul.f32 %v2179_v57, %v866_v61 }
 0x7c6   :  { %v868_v3 = vadd.f32 %v2179_v57, %v867_v1 }
 0x7c8   :  { %v872_v5 = vsel %vm871_vm1, %v2179_v57, %v868_v3 }
 0x7c9   :  { %v877_v6 = vsel %vm874_vm2, %v876_v4, %v872_v5 }
 0x7ca   :  { %v894_v9 = vmul.f32 1.0614054, %v877_v6 }
 0x7cc   :  { %v896_v10 = vadd.f32 -1.4531521, %v894_v9 }
 0x7ce   :  { %v898_v12 = vmul.f32 %v896_v10, %v877_v6 }
 0x7d0   :  { %v900_v13 = vadd.f32 1.4214138, %v898_v12 }
 0x7d2   :  { %v902_v16 = vmul.f32 %v900_v13, %v877_v6 }
 0x7d4   :  { %v904_v14 = vadd.f32 -0.28449672, %v902_v16 }
 0x7d6   :  { %v906_v34 = vmul.f32 %v904_v14, %v877_v6 }
 0x7d8   :  { %v908_v17 = vadd.f32 0.2548296, %v906_v34 }
 0x7da   :  { %v910_v18 = vmul.f32 %v908_v17, %v877_v6 }
 0x7dc   :  { %v920_v20 = vmul.f32 %v2181_v19, %v910_v18 }
 0x7de   :  { %v922_v21 = vsub.f32 1.0, %v920_v20 }
 0x7e0   :  { %v926_v22 = vsub.f32 0.0, %v922_v21 }
 0x7e2   :  { %v928_v23 = vsel %vm924_vm3, %v922_v21, %v926_v22 }
 0x7e3   :  { %v930_v25 = vadd.f32 1.0, %v928_v23  ;;  %v2027_v23 = vld [vmem:[%s2918_s4 + $0x38] sm:$0xff] }
 0x7e4   :  { %1062 = vmatpush.msra.mxu2 %v2027_v23 }
 0x7e5   :  { %v932_v26 = vmul.f32 %v930_v25, %v854_v24  ;;  %v2026_v25 = vld [vmem:[%s2918_s4 + $0x30] sm:$0xff] }
 0x7e6   :  { %1063 = vmatpush.msra.mxu2 %v2026_v25 }
 0x7e7   :  { %2022 = vmatmul.msk.f32.vlgmr.msrb.gmra.mxu1 %vm946_vm4, %v932_v26  ;;  %v2025_v26 = vld [vmem:[%s2918_s4 + $0x28] sm:$0xff] }
 0x7e8   :  { %1064 = vmatpush.msra.mxu2 %v2025_v26 }
 0x80a   :  { %v768_v27 = vpop.xlane.xlu0 %767 }
 0x80b   :  { %v770_v28 = vmul.f32 %v768_v27, %v2348_v8 }
 0x80d   :  { %v772_v29 = vsub.f32 %v2567_v47, %v770_v28  ;;  %v2024_v28 = vld [vmem:[%s2918_s4 + $0x20] sm:$0xff] }
 0x80e   :  { %1065 = vmatpush.msra.mxu2 %v2024_v28 }
 0x80f   :  { %v774_v30 = vmul.f32 %v772_v29, %v772_v29 }
 0x811   :  { %v778_v31 = vsel %vm63_vm0, %v774_v30, 0.0 }
 0x812   :  { %779 = vadd.xlane.f32.xlu2 %v778_v31 }
 0x864   :  { %v970_v35 = vpop.f32.mrf.mxu1 }
 0x865   :  { %v971_v36 = vadd.f32 %v2608_v32, %v970_v35 }
 0x867   :  { %v976_v38 = vadd.f32 %v971_v36, %v2562_v43 }
 0x869   :  { %v980_v39 = vsel %vm63_vm0, %v976_v38, 0.0 }
 0x86a   :  { %981 = vadd.xlane.f32.xlu1 %v980_v39 }
 0x885   :  { %v780_v40 = vpop.xlane.xlu2 %779 }
 0x886   :  { %v782_v45 = vmul.f32 %v780_v40, %v2348_v8 }
 0x888   :  { %v784_v46 = vadd.f32 1e-05, %v782_v45 }
 0x88a   :  { %2182 = vrsqrt.f32 %v784_v46  ;;  %vm801_vm7 = vweird.f32 %v784_v46 }
 0x890   :  { %v2183_v47 = vpop.eup %2182 }
 0x891   :  { %v796_v48 = vmul.f32 %v2183_v47, %v784_v46  ;;  %vm802_vm6 = vweird.f32 %v2183_v47 }
 0x892   :  { %vm803_vm8 = vmor %vm801_vm7, %vm802_vm6 }
 0x893   :  { %v797_v50 = vmul.f32 %v2183_v47, %v796_v48 }
 0x895   :  { %v798_v51 = vmul.f32 0.5, %v797_v50  ;;  %v2125_v50 = vld [vmem:[%s2928_s14] ss:$0 sm:$0xff] }
 0x897   :  { %v799_v52 = vsub.f32 1.5, %v798_v51 }
 0x899   :  { %v800_v53 = vmul.f32 %v2183_v47, %v799_v52 }
 0x89b   :  { %v804_v54 = vsel %vm803_vm8, %v2183_v47, %v800_v53  ;;  %v2126_v53 = vld [vmem:[%s2929_s15] ss:$0 sm:$0xff] }
 0x89c   :  { %v806_v33 = vmul.f32 %v804_v54, %v772_v29 }
 0x89e   :  { %v811_v43 = vmul.f32 %v2553_v37, %v806_v33 }
 0x8a0   :  { %v2616_v63 = vadd.f32 %v2558_v41, %v811_v43 }
 0x8a2   :  { %2021 = vmatmul.msk.f32.gmra.mxu0 %vm63_vm0, %v2616_v63 }
 0x8dd   :  { %v982_v55 = vpop.xlane.xlu1 %981 }
 0x8de   :  { %v986_v56 = vmul.f32 %v982_v55, %v2348_v8 }
 0x8e0   :  { %v2621_v57 = vsub.f32 %v976_v38, %v986_v56 }
 0x8e2   :  { %v990_v58 = vmul.f32 %v2621_v57, %v2621_v57 }
 0x8e4   :  { %v992_v59 = vsel %vm63_vm0, %v990_v58, 0.0 }
 0x8e5   :  { %993 = vadd.xlane.f32.xlu2 %v992_v59 }
 0x91f   :  { %v851_v60 = vpop.f32.mrf.mxu0 }
 0x920   :  { %v852_v37 = vadd.f32 %v2574_v49, %v851_v60 }
 0x922   :  { %v857_v61 = vmul.f32 0.70710677, %v852_v37  ;;  %v855_v29 = vmul.f32 0.5, %v852_v37 }
 0x924   :  { %v859_v41 = vand.u32 2147483647, %v857_v61  ;;  %vm925_vm15 = vcmp.ge.f32.partialorder %v857_v61, 0.0 }
 0x926   :  { %v861_v62 = vmul.f32 0.3275911, %v859_v41  ;;  %v913_v9 = vsub.f32 0.0, %v859_v41 }
 0x928   :  { %v863_v0 = vadd.f32 1.0, %v861_v62  ;;  %v915_v12 = vmul.f32 %v913_v9, %v859_v41 }
 0x92a   :  { %2184 = vrcp.f32 %v863_v0  ;;  %v890_v2 = vand.u32 2147483648, %v863_v0  ;;  %v888_v4 = vand.u32 2147483647, %v863_v0  ;;  %vm884_vm12 = vweird.f32 %v863_v0 }
 0x92b   :  { %v918_v16 = vmul.f32 1.442695, %v915_v12 }
 0x92c   :  { %v891_v6 = vor.u32 1.1754944e-38, %v890_v2  ;;  %vm889_vm14 = vcmp.eq.f32.partialorder %v888_v4, 8.507059e+37 }
 0x92d   :  { %2186 = vpow2.f32 %v918_v16 }
 0x930   :  { %v2185_v1 = vpop.eup %2184 }
 0x931   :  { %v880_v42 = vmul.f32 %v2185_v1, %v863_v0  ;;  %vm885_vm11 = vweird.f32 %v2185_v1 }
 0x932   :  { %vm886_vm13 = vmor %vm884_vm12, %vm885_vm11 }
 0x933   :  { %v881_v44 = vsub.f32 1.0, %v880_v42  ;;  %v2187_v20 = vpop.eup %2186 }
 0x935   :  { %v882_v3 = vmul.f32 %v2185_v1, %v881_v44 }
 0x937   :  { %v883_v5 = vadd.f32 %v2185_v1, %v882_v3 }
 0x939   :  { %v887_v7 = vsel %vm886_vm13, %v2185_v1, %v883_v5 }
 0x93a   :  { %v892_v49 = vsel %vm889_vm14, %v891_v6, %v887_v7 }
 0x93b   :  { %v895_v10 = vmul.f32 1.0614054, %v892_v49 }
 0x93d   :  { %v897_v11 = vadd.f32 -1.4531521, %v895_v10 }
 0x93f   :  { %v899_v13 = vmul.f32 %v897_v11, %v892_v49 }
 0x941   :  { %v901_v15 = vadd.f32 1.4214138, %v899_v13 }
 0x943   :  { %v903_v14 = vmul.f32 %v901_v15, %v892_v49 }
 0x945   :  { %v905_v34 = vadd.f32 -0.28449672, %v903_v14 }
 0x947   :  { %v907_v17 = vmul.f32 %v905_v34, %v892_v49 }
 0x949   :  { %v909_v18 = vadd.f32 0.2548296, %v907_v17 }
 0x94b   :  { %v911_v19 = vmul.f32 %v909_v18, %v892_v49  ;;  %v2128_v18 = vld [vmem:[%s2919_s1] ss:$0 sm:$0xff] }
 0x94d   :  { %v921_v21 = vmul.f32 %v2187_v20, %v911_v19 }
 0x94f   :  { %v923_v22 = vsub.f32 1.0, %v921_v21 }
 0x951   :  { %v927_v24 = vsub.f32 0.0, %v923_v22 }
 0x953   :  { %v929_v27 = vsel %vm925_vm15, %v923_v22, %v927_v24 }
 0x954   :  { %v931_v30 = vadd.f32 1.0, %v929_v27 }
 0x956   :  { %v933_v31 = vmul.f32 %v931_v30, %v855_v29 }
 0x958   :  { %2023 = vmatmul.msk.f32.gmra.mxu1 %vm946_vm4, %v933_v31  ;;  %v994_v35 = vpop.xlane.xlu2 %993 }
 0x959   :  { %v998_v36 = vmul.f32 %v994_v35, %v2348_v8 }
 0x95b   :  { %v1000_v38 = vadd.f32 1e-05, %v998_v36 }
 0x95d   :  { %2188 = vrsqrt.f32 %v1000_v38  ;;  %vm1008_vm2 = vweird.f32 %v1000_v38 }
 0x963   :  { %v2189_v39 = vpop.eup %2188 }
 0x964   :  { %v1003_v40 = vmul.f32 %v2189_v39, %v1000_v38  ;;  %vm1009_vm1 = vweird.f32 %v2189_v39 }
 0x965   :  { %vm1010_vm3 = vmor %vm1008_vm2, %vm1009_vm1 }
 0x966   :  { %v1004_v45 = vmul.f32 %v2189_v39, %v1003_v40 }
 0x968   :  { %v1005_v46 = vmul.f32 0.5, %v1004_v45 }
 0x96a   :  { %v1006_v47 = vsub.f32 1.5, %v1005_v46 }
 0x96c   :  { %v1007_v48 = vmul.f32 %v2189_v39, %v1006_v47 }
 0x96e   :  { %v1011_v51 = vsel %vm1010_vm3, %v2189_v39, %v1007_v48 }
 0x96f   :  { %v1022_v52 = vmul.f32 %v1011_v51, %v2621_v57  ;;  %v2127_v57 = vld [vmem:[%s2917_s5 + $0x1] ss:$0 sm:$0xff]  ;;  %s2942_s5 = smov 120  }
 0x971   :  { %v1027_v54 = vmul.f32 %v2125_v50, %v1022_v52 }
 0x973   :  { %v2648_v33 = vadd.f32 %v2126_v53, %v1027_v54 }
 0x975   :  { %2029 = vmatmul.msk.f32.vlgmr.msra.gmra.mxu2 %vm63_vm0, %v2648_v33 }
 0x9d5   :  { %v973_v43 = vpop.f32.mrf.mxu1 }
 0x9d6   :  { %v974_v55 = vadd.f32 %v2608_v32, %v973_v43 }
 0x9d8   :  { %v977_v56 = vadd.f32 %v974_v55, %v2616_v63 }
 0x9da   :  { %v983_v58 = vsel %vm63_vm0, %v977_v56, 0.0 }
 0x9db   :  { %984 = vadd.xlane.f32.xlu0 %v983_v58 }
 0x9f8   :  { %v1067_v59 = vpop.f32.mrf.mxu2 }
 0x9f9   :  { %v2658_v60 = vadd.f32 %v2127_v57, %v1067_v59 }
 0x9fb   :  { %1078 = vrot.lane.b32.xlu2 %v2658_v60, %s2242_s20  ;;  %1076 = vrot.lane.b32.xlu1 %v2658_v60, %s2241_s2 }
 0xa03   :  { %1084 = vrot.lane.b32.xlu1 %v2658_v60, %s2244_s22 }
 0xa4e   :  { %v985_v32 = vpop.xlane.xlu0 %984 }
 0xa4f   :  { %v987_v63 = vmul.f32 %v985_v32, %v2348_v8 }
 0xa51   :  { %v989_v37 = vsub.f32 %v977_v56, %v987_v63 }
 0xa53   :  { %v991_v61 = vmul.f32 %v989_v37, %v989_v37 }
 0xa55   :  { %v995_v41 = vsel %vm63_vm0, %v991_v61, 0.0  ;;  %v1079_v62 = vpop.permute.xlu2 %1078 }
 0xa56   :  { %996 = vadd.xlane.f32.xlu0 %v995_v41  ;;  %1162 = vrot.lane.b32.xlu1 %v1079_v62, %s2244_s22 }
 0xa6a   :  { %1074 = vrot.lane.b32.xlu0 %v2658_v60, %s2942_s5 }
 0xa6d   :  { %v1077_v0 = vpop.permute.xlu1 %1076 }
 0xa6e   :  { %1136 = vrot.lane.b32.xlu2 %v1077_v0, %s2244_s22  ;;  %v2105_v28 = vpack.i.bf16 %v1079_v62, %v1077_v0 }
 0xa75   :  { %v1085_v1 = vpop.permute.xlu1 %1084 }
 0xa76   :  { %2031 = vmatpush.xpose.msk.msra.mxu3 %vm175_vm5, %v1085_v1 }
 0xa79   :  { %2032 = vmatmul.msk.f32.vlgmr.msra.gmra.mxu3 %vm175_vm5, %v2658_v60 }
 0xac8   :  { %v1137_v42 = vpop.permute.xlu2 %1136  ;;  %v1163_v44 = vpop.permute.xlu1 %1162 }
 0xac9   :  { %v997_v2 = vpop.xlane.xlu0 %996  ;;  %2035 = vmatpush.xpose.msk.msrb.mxu2 %vm175_vm5, %v1137_v42  ;;  %2037 = vmatpush.xpose.msk.msrb.mxu3 %vm175_vm5, %v1163_v44 }
 0xaca   :  { %v999_v3 = vmul.f32 %v997_v2, %v2348_v8 }
 0xacc   :  { %v1001_v4 = vadd.f32 1e-05, %v999_v3  ;;  %2038 = vmatmul.msk.f32.vlgmr.msrb.gmra.mxu3 %vm175_vm5, %v1079_v62 }
 0xace   :  { %2190 = vrsqrt.f32 %v1001_v4  ;;  %vm1018_vm7 = vweird.f32 %v1001_v4 }
 0xad4   :  { %v2191_v5 = vpop.eup %2190 }
 0xad5   :  { %v1013_v6 = vmul.f32 %v2191_v5, %v1001_v4  ;;  %vm1019_vm6 = vweird.f32 %v2191_v5 }
 0xad6   :  { %vm1020_vm8 = vmor %vm1018_vm7, %vm1019_vm6 }
 0xad7   :  { %v1014_v7 = vmul.f32 %v2191_v5, %v1013_v6 }
 0xad9   :  { %v1015_v9 = vmul.f32 0.5, %v1014_v7 }
 0xadb   :  { %v1016_v49 = vsub.f32 1.5, %v1015_v9 }
 0xadc   :  { %v1075_v10 = vpop.permute.xlu0 %1074 }
 0xadd   :  { %v1017_v11 = vmul.f32 %v2191_v5, %v1016_v49  ;;  %1110 = vrot.lane.b32.xlu0 %v1075_v10, %s2244_s22 }
 0xadf   :  { %v1021_v12 = vsel %vm1020_vm8, %v2191_v5, %v1017_v11 }
 0xae0   :  { %v1023_v13 = vmul.f32 %v1021_v12, %v989_v37 }
 0xae2   :  { %v1028_v15 = vmul.f32 %v2125_v50, %v1023_v13 }
 0xae4   :  { %v2680_v16 = vadd.f32 %v2126_v53, %v1028_v15 }
 0xae6   :  { %2030 = vmatmul.msk.f32.gmra.mxu2 %vm63_vm0, %v2680_v16 }
 0xaee   :  { %2036 = vmatmul.msk.f32.vlgmr.msrb.gmra.mxu2 %vm175_vm5, %v1077_v0 }
 0xafc   :  { %v1107_v22 = vpop.f32.mrf.mxu3 }
 0xafd   :  { %v1108_v26 = vadd.f32 %v2128_v18, %v1107_v22 }
 0xaff   :  { %v1188_v27 = vsel %vm175_vm5, %v1108_v26, -inf }
 0xb4f   :  { %v1111_v14 = vpop.permute.xlu0 %1110  ;;  %v1185_v23 = vpop.f32.mrf.mxu3 }
 0xb50   :  { %2033 = vmatpush.xpose.msk.msra.mxu0 %vm175_vm5, %v1111_v14  ;;  %v1186_v24 = vadd.f32 %v2128_v18, %v1185_v23 }
 0xb52   :  { %v1197_v25 = vsel %vm175_vm5, %v1186_v24, -inf }
 0xb53   :  { %2034 = vmatmul.msk.f32.vlgmr.msra.gmra.mxu0 %vm175_vm5, %v1075_v10 }
 0xb69   :  { %v1070_v34 = vpop.f32.mrf.mxu2 }
 0xb6a   :  { %v2687_v17 = vadd.f32 %v2127_v57, %v1070_v34  ;;  %v2129_v34 = vld [vmem:[%s2919_s1 + $0x1] ss:$0 sm:$0xff] }
 0xb6c   :  { %1356 = vrot.lane.b32.xlu1 %v2687_v17, %s2242_s20 }
 0xb71   :  { %v1159_v19 = vpop.f32.mrf.mxu2 }
 0xb72   :  { %v1160_v20 = vadd.f32 %v2128_v18, %v1159_v19 }
 0xb74   :  { %v1194_v21 = vsel %vm175_vm5, %v1160_v20, -inf }
 0xb75   :  { %1195 = vmax.xlane.f32.xlu2 %v1194_v21 }
 0xb8d   :  { %1354 = vrot.lane.b32.xlu2 %v2687_v17, %s2241_s2 }
 0xb96   :  { %1198 = vmax.xlane.f32.xlu1 %v1197_v25 }
 0xbb6   :  { %1189 = vmax.xlane.f32.xlu2 %v1188_v27 }
 0xbce   :  { %2106 = vrot.lane.b32.xlu2 %v2105_v28, %s2245_s3 }
 0xbd0   :  { %v1133_v29 = vpop.f32.mrf.mxu0 }
 0xbd1   :  { %v1134_v30 = vadd.f32 %v2128_v18, %v1133_v29 }
 0xbd3   :  { %v1191_v31 = vsel %vm175_vm5, %v1134_v30, -inf }
 0xbd4   :  { %1192 = vmax.xlane.f32.xlu0 %v1191_v31 }
 0xbd6   :  { %1258 = vrot.lane.b32.xlu2 %v1075_v10, %s2245_s3 }
 0xbde   :  { %1232 = vrot.lane.b32.xlu2 %v2658_v60, %s2245_s3  ;;  %v2710_v38 = vpop.permute.xlu1 %1356 }
 0xbe8   :  { %1352 = vrot.lane.b32.xlu0 %v2687_v17, %s2942_s5  ;;  %v1196_v35 = vpop.xlane.xlu2 %1195 }
 0xbe9   :  { %v1202_v56 = vsub.f32 %v1160_v20, %v1196_v35 }
 0xbeb   :  { %v1208_v57 = vmul.f32 1.442695, %v1202_v56 }
 0xbf0   :  { %v2706_v36 = vpop.permute.xlu2 %1354 }
 0xbf1   :  { %1414 = vrot.lane.b32.xlu1 %v2706_v36, %s2244_s22 }
 0xc09   :  { %v1199_v39 = vpop.xlane.xlu1 %1198 }
 0xc0a   :  { %v1203_v40 = vsub.f32 %v1186_v24, %v1199_v39 }
 0xc0c   :  { %v1210_v45 = vmul.f32 1.442695, %v1203_v40 }
 0xc0e   :  { %2192 = vpow2.f32 %v1210_v45 }
 0xc14   :  { %v2193_v46 = vpop.eup %2192 }
 0xc15   :  { %v1221_v47 = vsel %vm175_vm5, %v2193_v46, 0.0 }
 0xc1b   :  { %1222 = vadd.xlane.f32.xlu1 %v1221_v47 }
 0xc29   :  { %v1190_v48 = vpop.xlane.xlu2 %1189 }
 0xc2a   :  { %v1200_v41 = vsub.f32 %v1108_v26, %v1190_v48 }
 0xc2c   :  { %v1204_v62 = vmul.f32 1.442695, %v1200_v41 }
 0xc31   :  { %v2107_v50 = vpop.permute.xlu2 %2106 }
 0xc32   :  { %v2109_v51 = vunpack.i.h.bf16 %v2107_v50  ;;  %v2108_v52 = vunpack.i.l.bf16 %v2107_v50 }
 0xc34   :  { %1305 = vmatpush.msra.mxu2 %v2108_v52  ;;  %1331 = vmatpush.msra.mxu3 %v2109_v51 }
 0xc39   :  { %v1259_v53 = vpop.permute.xlu2 %1258 }
 0xc3a   :  { %1279 = vmatpush.msra.mxu1 %v1259_v53 }
 0xc41   :  { %v1233_v54 = vpop.permute.xlu2 %1232 }
 0xc42   :  { %1253 = vmatpush.msrb.mxu0 %v1233_v54 }
 0xc47   :  { %v1193_v43 = vpop.xlane.xlu0 %1192 }
 0xc48   :  { %v1201_v55 = vsub.f32 %v1134_v30, %v1193_v43 }
 0xc4a   :  { %v1206_v58 = vmul.f32 1.442695, %v1201_v55 }
 0xc4c   :  { %2194 = vpow2.f32 %v1206_v58 }
 0xc4d   :  { %2196 = vpow2.f32 %v1208_v57  ;;  %v2110_v57 = vpack.i.bf16 %v2710_v38, %v2706_v36 }
 0xc52   :  { %v2195_v59 = vpop.eup %2194 }
 0xc53   :  { %v1215_v60 = vsel %vm175_vm5, %v2195_v59, 0.0  ;;  %v2197_v32 = vpop.eup %2196 }
 0xc54   :  { %1216 = vadd.xlane.f32.xlu0 %v1215_v60  ;;  %v1218_v37 = vsel %vm175_vm5, %v2197_v32, 0.0 }
 0xc5a   :  { %v2714_v63 = vpop.permute.xlu0 %1352 }
 0xc5b   :  { %1388 = vrot.lane.b32.xlu1 %v2714_v63, %s2244_s22 }
 0xc5c   :  { %1219 = vadd.xlane.f32.xlu0 %v1218_v37 }
 0xc63   :  { %1362 = vrot.lane.b32.xlu1 %v2687_v17, %s2244_s22  ;;  %v1415_v61 = vpop.permute.xlu1 %1414 }
 0xc64   :  { %2048 = vmatpush.xpose.msk.msrb.mxu2 %vm175_vm5, %v1415_v61 }
 0xc70   :  { %1440 = vrot.lane.b32.xlu0 %v2710_v38, %s2244_s22 }
 0xc8e   :  { %v1223_v0 = vpop.xlane.xlu1 %1222 }
 0xc8f   :  { %2198 = vrcp.f32 %v1223_v0 }
 0xc90   :  { %2200 = vpow2.f32 %v1204_v62 }
 0xc95   :  { %v2199_v1 = vpop.eup %2198 }
 0xc96   :  { %v2201_v42 = vpop.eup %2200  ;;  %v1231_v44 = vmul.f32 %v2199_v1, %v2193_v46 }
 0xc97   :  { %v1212_v2 = vsel %vm175_vm5, %v2201_v42, 0.0 }
 0xc98   :  { %2042 = vmatmul.msk.f32.vlgmr.msra.gmra.mxu3 %vm175_vm5, %v1231_v44 }
 0xc9a   :  { %1213 = vadd.xlane.f32.xlu0 %v1212_v2 }
 0xcc7   :  { %v1217_v3 = vpop.xlane.xlu0 %1216 }
 0xcc8   :  { %2202 = vrcp.f32 %v1217_v3 }
 0xccd   :  { %v1389_v4 = vpop.permute.xlu1 %1388 }
 0xcce   :  { %v2203_v5 = vpop.eup %2202  ;;  %2046 = vmatpush.xpose.msk.msrb.mxu1 %vm175_vm5, %v1389_v4 }
 0xccf   :  { %v1229_v6 = vmul.f32 %v2203_v5, %v2195_v59  ;;  %v1220_v7 = vpop.xlane.xlu0 %1219 }
 0xcd0   :  { %2204 = vrcp.f32 %v1220_v7 }
 0xcd1   :  { %2040 = vmatmul.msk.f32.vlgmr.msra.gmra.mxu1 %vm175_vm5, %v1229_v6 }
 0xcd5   :  { %v1363_v9 = vpop.permute.xlu1 %1362 }
 0xcd6   :  { %v2205_v49 = vpop.eup %2204  ;;  %2044 = vmatpush.xpose.msk.msra.mxu0 %vm175_vm5, %v1363_v9 }
 0xcd7   :  { %v1230_v10 = vmul.f32 %v2205_v49, %v2197_v32 }
 0xcd9   :  { %2041 = vmatmul.msk.f32.vlgmr.msra.gmra.mxu2 %vm175_vm5, %v1230_v10  ;;  %2047 = vmatmul.msk.f32.vlgmr.msrb.gmra.mxu1 %vm175_vm5, %v2714_v63  ;;  %v2059_v10 = vld [vmem:[%s2920_s6 + $0x38] sm:$0xff] }
 0xce1   :  { %2049 = vmatmul.msk.f32.vlgmr.msrb.gmra.mxu2 %vm175_vm5, %v2706_v36 }
 0xce2   :  { %v1441_v11 = vpop.permute.xlu0 %1440 }
 0xce3   :  { %2050 = vmatpush.xpose.msk.msrb.mxu3 %vm175_vm5, %v1441_v11  ;;  %v2058_v11 = vld [vmem:[%s2920_s6 + $0x30] sm:$0xff] }
 0xce6   :  { %2051 = vmatmul.msk.f32.vlgmr.msrb.gmra.mxu3 %vm175_vm5, %v2710_v38 }
 0xd0d   :  { %v1214_v12 = vpop.xlane.xlu0 %1213 }
 0xd0e   :  { %2206 = vrcp.f32 %v1214_v12 }
 0xd14   :  { %v2207_v13 = vpop.eup %2206 }
 0xd15   :  { %v1228_v15 = vmul.f32 %v2207_v13, %v2201_v42  ;;  %v2057_v13 = vld [vmem:[%s2920_s6 + $0x28] sm:$0xff] }
 0xd17   :  { %2039 = vmatmul.msk.f32.vlgmr.msrb.gmra.mxu0 %vm175_vm5, %v1228_v15 }
 0xd1b   :  { %v1333_v22 = vpop.f32.mrf.mxu3 }
 0xd1f   :  { %2045 = vmatmul.msk.f32.vlgmr.msra.gmra.mxu0 %vm175_vm5, %v2687_v17 }
 0xd4e   :  { %v1281_v14 = vpop.f32.mrf.mxu1 }
 0xd56   :  { %v1411_v18 = vpop.f32.mrf.mxu1 }
 0xd57   :  { %v1412_v19 = vadd.f32 %v2129_v34, %v1411_v18 }
 0xd59   :  { %v1469_v20 = vsel %vm175_vm5, %v1412_v19, -inf }
 0xd5a   :  { %1470 = vmax.xlane.f32.xlu0 %v1469_v20 }
 0xd5c   :  { %v1307_v21 = vpop.f32.mrf.mxu2 }
 0xd64   :  { %v1437_v23 = vpop.f32.mrf.mxu2 }
 0xd65   :  { %v1438_v24 = vadd.f32 %v2129_v34, %v1437_v23 }
 0xd67   :  { %v1472_v25 = vsel %vm175_vm5, %v1438_v24, -inf }
 0xd68   :  { %1473 = vmax.xlane.f32.xlu2 %v1472_v25 }
 0xd69   :  { %v1463_v26 = vpop.f32.mrf.mxu3 }
 0xd6a   :  { %v1464_v27 = vadd.f32 %v2129_v34, %v1463_v26 }
 0xd6c   :  { %v1475_v28 = vsel %vm175_vm5, %v1464_v27, -inf }
 0xd6d   :  { %1476 = vmax.xlane.f32.xlu1 %v1475_v28 }
 0xd94   :  { %v2746_v29 = vpop.f32.mrf.mxu0 }
 0xd9c   :  { %v1385_v30 = vpop.f32.mrf.mxu0 }
 0xd9d   :  { %v1386_v31 = vadd.f32 %v2129_v34, %v1385_v30  ;;  %v2056_v34 = vld [vmem:[%s2920_s6 + $0x20] sm:$0xff] }
 0xd9f   :  { %v1466_v35 = vsel %vm175_vm5, %v1386_v31, -inf }
 0xda0   :  { %1467 = vmax.xlane.f32.xlu0 %v1466_v35 }
 0xdcd   :  { %v1471_v39 = vpop.xlane.xlu0 %1470 }
 0xdce   :  { %v1479_v40 = vsub.f32 %v1412_v19, %v1471_v39 }
 0xdd0   :  { %v1484_v45 = vmul.f32 1.442695, %v1479_v40 }
 0xdd2   :  { %2208 = vpow2.f32 %v1484_v45 }
 0xdd8   :  { %v2209_v46 = vpop.eup %2208 }
 0xdd9   :  { %v1493_v47 = vsel %vm175_vm5, %v2209_v46, 0.0 }
 0xdda   :  { %1494 = vadd.xlane.f32.xlu0 %v1493_v47 }
 0xddb   :  { %v1474_v48 = vpop.xlane.xlu2 %1473 }
 0xddc   :  { %v1480_v50 = vsub.f32 %v1438_v24, %v1474_v48  ;;  %v2130_v24 = vld [vmem:[%s2921_s7 + $0x1] ss:$0 sm:$0xff] }
 0xdde   :  { %v1486_v51 = vmul.f32 1.442695, %v1480_v50 }
 0xde0   :  { %2210 = vpow2.f32 %v1486_v51  ;;  %v1477_v52 = vpop.xlane.xlu1 %1476 }
 0xde1   :  { %v1481_v53 = vsub.f32 %v1464_v27, %v1477_v52 }
 0xde3   :  { %v1488_v54 = vmul.f32 1.442695, %v1481_v53 }
 0xde5   :  { %2212 = vpow2.f32 %v1488_v54  ;;  %v2068_v54 = vld [vmem:[%s2924_s10 + $0x38] sm:$0xff] }
 0xde6   :  { %v2211_v43 = vpop.eup %2210 }
 0xde7   :  { %v1496_v55 = vsel %vm175_vm5, %v2211_v43, 0.0 }
 0xde8   :  { %1497 = vadd.xlane.f32.xlu2 %v1496_v55  ;;  %v2066_v55 = vld [vmem:[%s2924_s10 + $0x28] sm:$0xff] }
 0xdeb   :  { %v2213_v56 = vpop.eup %2212 }
 0xdec   :  { %v1499_v58 = vsel %vm175_vm5, %v2213_v56, 0.0 }
 0xded   :  { %1500 = vadd.xlane.f32.xlu1 %v1499_v58 }
 0xe00   :  { %2111 = vrot.lane.b32.xlu2 %v2110_v57, %s2245_s3 }
 0xe06   :  { %1536 = vrot.lane.b32.xlu1 %v2714_v63, %s2245_s3 }
 0xe08   :  { %1337 = vrot.lane.b32.xlu2 %v1281_v14, %s2247_s28 }
 0xe0e   :  { %1341 = vrot.lane.b32.xlu1 %v1307_v21, %s2248_s29 }
 0xe10   :  { %1345 = vrot.lane.b32.xlu2 %v1333_v22, %s2246_s27 }
 0xe13   :  { %v1468_v59 = vpop.xlane.xlu0 %1467 }
 0xe14   :  { %v1478_v60 = vsub.f32 %v1386_v31, %v1468_v59 }
 0xe16   :  { %v1482_v32 = vmul.f32 1.442695, %v1478_v60 }
 0xe18   :  { %2214 = vpow2.f32 %v1482_v32 }
 0xe1e   :  { %v2215_v37 = vpop.eup %2214 }
 0xe1f   :  { %v1490_v61 = vsel %vm175_vm5, %v2215_v37, 0.0 }
 0xe20   :  { %1491 = vadd.xlane.f32.xlu0 %v1490_v61 }
 0xe34   :  { %1510 = vrot.lane.b32.xlu0 %v2687_v17, %s2245_s3 }
 0xe4d   :  { %v1495_v2 = vpop.xlane.xlu0 %1494 }
 0xe5b   :  { %v1498_v36 = vpop.xlane.xlu2 %1497 }
 0xe5c   :  { %2216 = vrcp.f32 %v1498_v36 }
 0xe60   :  { %v1501_v38 = vpop.xlane.xlu1 %1500 }
 0xe61   :  { %2218 = vrcp.f32 %v1501_v38  ;;  %v2816_v38 = vld [vmem:[%s2922_s8 + $0x1] ss:$0 sm:$0xff] }
 0xe62   :  { %v2217_v63 = vpop.eup %2216  ;;  %2220 = vrcp.f32 %v1495_v2 }
 0xe63   :  { %v2112_v41 = vpop.permute.xlu2 %2111  ;;  %v1508_v1 = vmul.f32 %v2217_v63, %v2211_v43  ;;  %v2067_v43 = vld [vmem:[%s2924_s10 + $0x30] sm:$0xff] }
 0xe64   :  { %v2114_v62 = vunpack.i.h.bf16 %v2112_v41  ;;  %v2113_v0 = vunpack.i.l.bf16 %v2112_v41 }
 0xe66   :  { %1583 = vmatpush.msra.mxu2 %v2113_v0  ;;  %1609 = vmatpush.msra.mxu3 %v2114_v62  ;;  %v2821_v62 = vld [vmem:[%s2923_s9 + $0x1] ss:$0 sm:$0xff] }
 0xe67   :  { %v2219_v42 = vpop.eup %2218  ;;  %2054 = vmatmul.msk.f32.vlgmr.msra.gmra.mxu2 %vm175_vm5, %v1508_v1 }
 0xe68   :  { %v1509_v44 = vmul.f32 %v2219_v42, %v2213_v56  ;;  %v2221_v17 = vpop.eup %2220 }
 0xe69   :  { %v1507_v3 = vmul.f32 %v2221_v17, %v2209_v46 }
 0xe6a   :  { %2055 = vmatmul.msk.f32.vlgmr.msra.gmra.mxu3 %vm175_vm5, %v1509_v44 }
 0xe6b   :  { %v1338_v7 = vpop.permute.xlu2 %1337 }
 0xe6c   :  { %v1348_v15 = vsel %vm175_vm5, %v2746_v29, %v1338_v7 }
 0xe73   :  { %v1346_v18 = vpop.permute.xlu2 %1345 }
 0xe78   :  { %v1537_v4 = vpop.permute.xlu1 %1536 }
 0xe79   :  { %1557 = vmatpush.msra.mxu1 %v1537_v4  ;;  %v2838_v4 = vld [vmem:[%s2925_s11 + $0x1] ss:$0 sm:$0xff] }
 0xe7a   :  { %2053 = vmatmul.msk.f32.vlgmr.msra.gmra.mxu1 %vm175_vm5, %v1507_v3 }
 0xe7b   :  { %1756 = vmatpush.msrb.mxu1 %v2068_v54 }
 0xe7d   :  { %1757 = vmatpush.msrb.mxu1 %v2067_v43 }
 0xe7f   :  { %1758 = vmatpush.msrb.mxu1 %v2066_v55 }
 0xe80   :  { %v1342_v12 = vpop.permute.xlu1 %1341 }
 0xe81   :  { %v1349_v14 = vsel %vm439_vm9, %v1348_v15, %v1342_v12  ;;  %v2078_v12 = vld [vmem:[%s2927_s12 + $0x70] sm:$0xff]  ;;  %v2076_v15 = vld [vmem:[%s2927_s12 + $0x60] sm:$0xff] }
 0xe82   :  { %v1350_v19 = vsel %vm441_vm10, %v1349_v14, %v1346_v18  ;;  %v2075_v18 = vld [vmem:[%s2927_s12 + $0x58] sm:$0xff] }
 0xe93   :  { %v1492_v5 = vpop.xlane.xlu0 %1491 }
 0xe94   :  { %2222 = vrcp.f32 %v1492_v5 }
 0xe9a   :  { %v2223_v6 = vpop.eup %2222 }
 0xe9b   :  { %v1506_v9 = vmul.f32 %v2223_v6, %v2215_v37 }
 0xea6   :  { %v1511_v49 = vpop.permute.xlu0 %1510 }
 0xea7   :  { %1531 = vmatpush.msrb.mxu0 %v1511_v49 }
 0xea8   :  { %2052 = vmatmul.msk.f32.vlgmr.msrb.gmra.mxu0 %vm175_vm5, %v1506_v9 }
 0xea9   :  { %1657 = vmatpush.msra.mxu0 %v2059_v10 }
 0xeab   :  { %1658 = vmatpush.msra.mxu0 %v2058_v11  ;;  %v2079_v11 = vld [vmem:[%s2927_s12 + $0x78] sm:$0xff] }
 0xeac   :  { %1875 = vmatpush.msrb.mxu2 %v2079_v11 }
 0xead   :  { %1659 = vmatpush.msra.mxu0 %v2057_v13  ;;  %v2077_v13 = vld [vmem:[%s2927_s12 + $0x68] sm:$0xff] }
 0xeae   :  { %1876 = vmatpush.msrb.mxu2 %v2078_v12 }
 0xeaf   :  { %1660 = vmatpush.msra.mxu0 %v2056_v34 }
 0xeb0   :  { %2061 = vmatmul.msk.f32.vlgmr.msra.gmra.mxu0 %vm63_vm0, %v1350_v19  ;;  %1877 = vmatpush.msrb.mxu2 %v2077_v13 }
 0xeb2   :  { %1878 = vmatpush.msrb.mxu2 %v2076_v15 }
 0xeb4   :  { %1879 = vmatpush.msrb.mxu2 %v2075_v18 }
 0xeea   :  { %v1585_v20 = vpop.f32.mrf.mxu2 }
 0xeeb   :  { %1619 = vrot.lane.b32.xlu1 %v1585_v20, %s2248_s29  ;;  %v2074_v20 = vld [vmem:[%s2927_s12 + $0x50] sm:$0xff] }
 0xeec   :  { %1880 = vmatpush.msrb.mxu2 %v2074_v20 }
 0xeed   :  { %v1611_v21 = vpop.f32.mrf.mxu3 }
 0xeee   :  { %1623 = vrot.lane.b32.xlu2 %v1611_v21, %s2246_s27 }
 0xef7   :  { %v1559_v22 = vpop.f32.mrf.mxu1 }
 0xef8   :  { %1615 = vrot.lane.b32.xlu0 %v1559_v22, %s2247_s28 }
 0xf25   :  { %v1533_v23 = vpop.f32.mrf.mxu0 }
 0xf2d   :  { %v1662_v25 = vpop.f32.mrf.mxu0 }
 0xf2e   :  { %v1663_v26 = vadd.f32 %v2130_v24, %v1662_v25 }
 0xf30   :  { %v1668_v27 = vadd.f32 %v1663_v26, %v2648_v33  ;;  %v2072_v26 = vld [vmem:[%s2927_s12 + $0x40] sm:$0xff] }
 0xf32   :  { %v1674_v28 = vsel %vm63_vm0, %v1668_v27, 0.0 }
 0xf33   :  { %1675 = vadd.xlane.f32.xlu0 %v1674_v28 }
 0xf48   :  { %v1624_v35 = vpop.permute.xlu2 %1623 }
 0xf5d   :  { %v1620_v30 = vpop.permute.xlu1 %1619 }
 0xf6a   :  { %v1616_v29 = vpop.permute.xlu0 %1615 }
 0xf6b   :  { %v1626_v31 = vsel %vm175_vm5, %v1533_v23, %v1616_v29 }
 0xf6c   :  { %v1627_v39 = vsel %vm439_vm9, %v1626_v31, %v1620_v30 }
 0xf6d   :  { %v1628_v40 = vsel %vm441_vm10, %v1627_v39, %v1624_v35 }
 0xf6e   :  { %2062 = vmatmul.msk.f32.gmra.mxu0 %vm63_vm0, %v1628_v40 }
 0xfa6   :  { %v1676_v45 = vpop.xlane.xlu0 %1675 }
 0xfa7   :  { %v1680_v46 = vmul.f32 %v1676_v45, %v2348_v8 }
 0xfa9   :  { %v1682_v47 = vsub.f32 %v1668_v27, %v1680_v46 }
 0xfab   :  { %v1684_v48 = vmul.f32 %v1682_v47, %v1682_v47 }
 0xfad   :  { %v1686_v33 = vsel %vm63_vm0, %v1684_v48, 0.0 }
 0xfae   :  { %1687 = vadd.xlane.f32.xlu2 %v1686_v33 }
 0xfeb   :  { %v1665_v50 = vpop.f32.mrf.mxu0 }
 0xfec   :  { %v1666_v51 = vadd.f32 %v2130_v24, %v1665_v50  ;;  %v2073_v24 = vld [vmem:[%s2927_s12 + $0x48] sm:$0xff] }
 0xfed   :  { %1881 = vmatpush.msrb.mxu2 %v2073_v24 }
 0xfee   :  { %v1669_v52 = vadd.f32 %v1666_v51, %v2680_v16  ;;  %v2065_v16 = vld [vmem:[%s2924_s10 + $0x20] sm:$0xff] }
 0xfef   :  { %1759 = vmatpush.msrb.mxu1 %v2065_v16  ;;  %1882 = vmatpush.msrb.mxu2 %v2072_v26 }
 0xff0   :  { %v1677_v53 = vsel %vm63_vm0, %v1669_v52, 0.0 }
 0xff1   :  { %1678 = vadd.xlane.f32.xlu1 %v1677_v53 }
0x1021   :  { %v1688_v56 = vpop.xlane.xlu2 %1687 }
0x1022   :  { %v1692_v58 = vmul.f32 %v1688_v56, %v2348_v8 }
0x1024   :  { %v1694_v57 = vadd.f32 1e-05, %v1692_v58 }
0x1026   :  { %2224 = vrsqrt.f32 %v1694_v57  ;;  %vm1702_vm9 = vweird.f32 %v1694_v57 }
0x102c   :  { %v2225_v59 = vpop.eup %2224 }
0x102d   :  { %v1697_v60 = vmul.f32 %v2225_v59, %v1694_v57  ;;  %vm1703_vm5 = vweird.f32 %v2225_v59 }
0x102e   :  { %vm1704_vm10 = vmor %vm1702_vm9, %vm1703_vm5 }
0x102f   :  { %v1698_v32 = vmul.f32 %v2225_v59, %v1697_v60 }
0x1031   :  { %v1699_v37 = vmul.f32 0.5, %v1698_v32 }
0x1033   :  { %v1700_v61 = vsub.f32 1.5, %v1699_v37 }
0x1035   :  { %v1701_v36 = vmul.f32 %v2225_v59, %v1700_v61 }
0x1037   :  { %v1705_v63 = vsel %vm1704_vm10, %v2225_v59, %v1701_v36 }
0x1038   :  { %v1716_v41 = vmul.f32 %v1705_v63, %v1682_v47 }
0x103a   :  { %v1721_v0 = vmul.f32 %v2816_v38, %v1716_v41 }
0x103c   :  { %v2825_v1 = vadd.f32 %v2821_v62, %v1721_v0 }
0x103e   :  { %2070 = vmatmul.msk.f32.vlgmr.msrb.gmra.mxu1 %vm63_vm0, %v2825_v1 }
0x1064   :  { %v1679_v42 = vpop.xlane.xlu1 %1678 }
0x1065   :  { %v1681_v44 = vmul.f32 %v1679_v42, %v2348_v8 }
0x1067   :  { %v2830_v2 = vsub.f32 %v1669_v52, %v1681_v44 }
0x1069   :  { %v1685_v17 = vmul.f32 %v2830_v2, %v2830_v2 }
0x106b   :  { %v1689_v3 = vsel %vm63_vm0, %v1685_v17, 0.0 }
0x106c   :  { %1690 = vadd.xlane.f32.xlu0 %v1689_v3  ;;  %v2134_v3 = vld [vmem:[%s2926_s13 + $0x1] ss:$0 sm:$0xff] }
0x10bb   :  { %v1761_v5 = vpop.f32.mrf.mxu1 }
0x10bc   :  { %v2841_v6 = vadd.f32 %v2838_v4, %v1761_v5 }
0x10be   :  { %v1769_v7 = vmul.f32 0.70710677, %v2841_v6  ;;  %v1767_v37 = vmul.f32 0.5, %v2841_v6 }
0x10c0   :  { %v1771_v9 = vand.u32 2147483647, %v1769_v7  ;;  %vm1837_vm15 = vcmp.ge.f32.partialorder %v1769_v7, 0.0 }
0x10c2   :  { %v1773_v49 = vmul.f32 0.3275911, %v1771_v9  ;;  %v1825_v30 = vsub.f32 0.0, %v1771_v9 }
0x10c4   :  { %v1775_v10 = vadd.f32 1.0, %v1773_v49  ;;  %v1827_v39 = vmul.f32 %v1825_v30, %v1771_v9 }
0x10c6   :  { %2226 = vrcp.f32 %v1775_v10  ;;  %v1788_v21 = vand.u32 2147483648, %v1775_v10  ;;  %v1786_v23 = vand.u32 2147483647, %v1775_v10  ;;  %vm1782_vm12 = vweird.f32 %v1775_v10 }
0x10c7   :  { %v1829_v46 = vmul.f32 1.442695, %v1827_v39 }
0x10c8   :  { %v1789_v27 = vor.u32 1.1754944e-38, %v1788_v21  ;;  %vm1787_vm14 = vcmp.eq.f32.partialorder %v1786_v23, 8.507059e+37 }
0x10c9   :  { %2228 = vpow2.f32 %v1829_v46 }
0x10cc   :  { %v2227_v14 = vpop.eup %2226 }
0x10cd   :  { %v1778_v34 = vmul.f32 %v2227_v14, %v1775_v10  ;;  %vm1783_vm11 = vweird.f32 %v2227_v14 }
0x10ce   :  { %vm1784_vm13 = vmor %vm1782_vm12, %vm1783_vm11 }
0x10cf   :  { %v1779_v19 = vsub.f32 1.0, %v1778_v34  ;;  %v2229_v43 = vpop.eup %2228 }
0x10d1   :  { %v1780_v22 = vmul.f32 %v2227_v14, %v1779_v19 }
0x10d3   :  { %v1781_v25 = vadd.f32 %v2227_v14, %v1780_v22 }
0x10d5   :  { %v1785_v28 = vsel %vm1784_vm13, %v2227_v14, %v1781_v25 }
0x10d6   :  { %v1790_v29 = vsel %vm1787_vm14, %v1789_v27, %v1785_v28 }
0x10d7   :  { %v1807_v31 = vmul.f32 1.0614054, %v1790_v29 }
0x10d9   :  { %v1809_v35 = vadd.f32 -1.4531521, %v1807_v31 }
0x10db   :  { %v1811_v40 = vmul.f32 %v1809_v35, %v1790_v29 }
0x10dd   :  { %v1813_v45 = vadd.f32 1.4214138, %v1811_v40 }
0x10df   :  { %v1815_v47 = vmul.f32 %v1813_v45, %v1790_v29  ;;  %v1691_v48 = vpop.xlane.xlu0 %1690 }
0x10e0   :  { %v1693_v33 = vmul.f32 %v1691_v48, %v2348_v8 }
0x10e1   :  { %v1817_v50 = vadd.f32 -0.28449672, %v1815_v47 }
0x10e2   :  { %v1695_v51 = vadd.f32 1e-05, %v1693_v33 }
0x10e3   :  { %v1819_v52 = vmul.f32 %v1817_v50, %v1790_v29 }
0x10e4   :  { %2230 = vrsqrt.f32 %v1695_v51  ;;  %vm1712_vm2 = vweird.f32 %v1695_v51 }
0x10e5   :  { %v1821_v53 = vadd.f32 0.2548296, %v1819_v52 }
0x10e7   :  { %v1823_v54 = vmul.f32 %v1821_v53, %v1790_v29 }
0x10e9   :  { %v1833_v55 = vmul.f32 %v2229_v43, %v1823_v54 }
0x10ea   :  { %v2231_v16 = vpop.eup %2230 }
0x10eb   :  { %v1835_v56 = vsub.f32 1.0, %v1833_v55  ;;  %v1707_v58 = vmul.f32 %v2231_v16, %v1695_v51  ;;  %vm1713_vm1 = vweird.f32 %v2231_v16 }
0x10ec   :  { %vm1714_vm3 = vmor %vm1712_vm2, %vm1713_vm1 }
0x10ed   :  { %v1839_v57 = vsub.f32 0.0, %v1835_v56  ;;  %v1708_v59 = vmul.f32 %v2231_v16, %v1707_v58 }
0x10ef   :  { %v1841_v60 = vsel %vm1837_vm15, %v1835_v56, %v1839_v57  ;;  %v1709_v32 = vmul.f32 0.5, %v1708_v59  ;;  %vm1953_vm15 = vcmask 1040384  }
0x10f0   :  { %v1843_v61 = vadd.f32 1.0, %v1841_v60 }
0x10f1   :  { %v1710_v36 = vsub.f32 1.5, %v1709_v32 }
0x10f2   :  { %v1845_v63 = vmul.f32 %v1843_v61, %v1767_v37 }
0x10f3   :  { %v1711_v41 = vmul.f32 %v2231_v16, %v1710_v36 }
0x10f4   :  { %2081 = vmatmul.msk.f32.vlgmr.msrb.gmra.mxu2 %vm946_vm4, %v1845_v63 }
0x10f5   :  { %v1715_v0 = vsel %vm1714_vm3, %v2231_v16, %v1711_v41  ;;  %v1958_v41 = vld [vmem:[%s2931_s16 + $0x18] sm:$0xff] }
0x10f6   :  { %v1717_v42 = vmul.f32 %v1715_v0, %v2830_v2  ;;  %v1957_v0 = vld [vmem:[%s2931_s16 + $0x10] sm:$0xff]  ;;  %1978 = vmatpush.msrb.mxu3 %v1958_v41 }
0x10f8   :  { %v1722_v44 = vmul.f32 %v2816_v38, %v1717_v42  ;;  %1979 = vmatpush.msrb.mxu3 %v1957_v0 }
0x10fa   :  { %v1727_v17 = vadd.f32 %v2821_v62, %v1722_v44  ;;  %v1956_v44 = vld [vmem:[%s2931_s16 + $0x8] sm:$0xff] }
0x10fb   :  { %1980 = vmatpush.msrb.mxu3 %v1956_v44 }
0x10fc   :  { %2071 = vmatmul.msk.f32.gmra.mxu1 %vm63_vm0, %v1727_v17 }
0x1177   :  { %v1884_v5 = vpop.f32.mrf.mxu2 }
0x1178   :  { %v1885_v6 = vadd.f32 %v2134_v3, %v1884_v5 }
0x1179   :  { %v1764_v7 = vpop.f32.mrf.mxu1 }
0x117a   :  { %v1765_v9 = vadd.f32 %v2838_v4, %v1764_v7  ;;  %v1890_v49 = vadd.f32 %v1885_v6, %v2825_v1 }
0x117c   :  { %v1770_v10 = vmul.f32 0.70710677, %v1765_v9  ;;  %v1896_v2 = vsel %vm63_vm0, %v1890_v49, 0.0  ;;  %v1768_v48 = vmul.f32 0.5, %v1765_v9 }
0x117d   :  { %1897 = vadd.xlane.f32.xlu1 %v1896_v2 }
0x117e   :  { %v1772_v38 = vand.u32 2147483647, %v1770_v10  ;;  %vm1838_vm9 = vcmp.ge.f32.partialorder %v1770_v10, 0.0 }
0x1180   :  { %v1774_v11 = vmul.f32 0.3275911, %v1772_v38  ;;  %v1826_v20 = vsub.f32 0.0, %v1772_v38 }
0x1182   :  { %v1776_v62 = vadd.f32 1.0, %v1774_v11  ;;  %v1828_v24 = vmul.f32 %v1826_v20, %v1772_v38  ;;  %v2136_v20 = vld [vmem:[%s2929_s15 + $0x1] ss:$0 sm:$0xff] }
0x1184   :  { %2232 = vrcp.f32 %v1776_v62  ;;  %v1803_v14 = vand.u32 2147483648, %v1776_v62  ;;  %v1801_v18 = vand.u32 2147483647, %v1776_v62  ;;  %vm1797_vm7 = vweird.f32 %v1776_v62 }
0x1185   :  { %v1831_v27 = vmul.f32 1.442695, %v1828_v24 }
0x1186   :  { %v1804_v4 = vor.u32 1.1754944e-38, %v1803_v14  ;;  %vm1802_vm5 = vcmp.eq.f32.partialorder %v1801_v18, 8.507059e+37 }
0x1187   :  { %2234 = vpow2.f32 %v1831_v27 }
0x118a   :  { %v2233_v12 = vpop.eup %2232 }
0x118b   :  { %v1793_v13 = vmul.f32 %v2233_v12, %v1776_v62  ;;  %vm1798_vm6 = vweird.f32 %v2233_v12 }
0x118c   :  { %vm1799_vm8 = vmor %vm1797_vm7, %vm1798_vm6 }
0x118d   :  { %v1794_v15 = vsub.f32 1.0, %v1793_v13  ;;  %v2235_v39 = vpop.eup %2234 }
0x118f   :  { %v1795_v34 = vmul.f32 %v2233_v12, %v1794_v15 }
0x1191   :  { %v1796_v19 = vadd.f32 %v2233_v12, %v1795_v34 }
0x1193   :  { %v1800_v1 = vsel %vm1799_vm8, %v2233_v12, %v1796_v19 }
0x1194   :  { %v1805_v21 = vsel %vm1802_vm5, %v1804_v4, %v1800_v1 }
0x1195   :  { %v1808_v22 = vmul.f32 1.0614054, %v1805_v21 }
0x1197   :  { %v1810_v23 = vadd.f32 -1.4531521, %v1808_v22 }
0x1199   :  { %v1812_v25 = vmul.f32 %v1810_v23, %v1805_v21 }
0x119b   :  { %v1814_v26 = vadd.f32 1.4214138, %v1812_v25  ;;  %v2137_v25 = vld [vmem:[%s2930_s17] ss:$0 sm:$0xff] }
0x119d   :  { %v1816_v28 = vmul.f32 %v1814_v26, %v1805_v21 }
0x119f   :  { %v1818_v29 = vadd.f32 -0.28449672, %v1816_v28 }
0x11a1   :  { %v1820_v30 = vmul.f32 %v1818_v29, %v1805_v21 }
0x11a3   :  { %v1822_v31 = vadd.f32 0.2548296, %v1820_v30 }
0x11a5   :  { %v1824_v35 = vmul.f32 %v1822_v31, %v1805_v21 }
0x11a7   :  { %v1834_v40 = vmul.f32 %v2235_v39, %v1824_v35 }
0x11a9   :  { %v1836_v45 = vsub.f32 1.0, %v1834_v40 }
0x11ab   :  { %v1840_v46 = vsub.f32 0.0, %v1836_v45 }
0x11ad   :  { %v1842_v47 = vsel %vm1838_vm9, %v1836_v45, %v1840_v46 }
0x11ae   :  { %v1844_v33 = vadd.f32 1.0, %v1842_v47 }
0x11b0   :  { %v1846_v50 = vmul.f32 %v1844_v33, %v1768_v48 }
0x11b2   :  { %2082 = vmatmul.msk.f32.gmra.mxu2 %vm946_vm4, %v1846_v50 }
0x11f0   :  { %v1898_v51 = vpop.xlane.xlu1 %1897 }
0x11f1   :  { %v1902_v53 = vmul.f32 %v1898_v51, %v2348_v8 }
0x11f3   :  { %v1904_v55 = vsub.f32 %v1890_v49, %v1902_v53 }
0x11f5   :  { %v1906_v56 = vmul.f32 %v1904_v55, %v1904_v55 }
0x11f7   :  { %v1908_v58 = vsel %vm63_vm0, %v1906_v56, 0.0 }
0x1235   :  { %v1887_v52 = vpop.f32.mrf.mxu2 }
0x1236   :  { %v1888_v54 = vadd.f32 %v2134_v3, %v1887_v52 }
0x1238   :  { %v1891_v43 = vadd.f32 %v1888_v54, %v1727_v17  ;;  %v1955_v17 = vld [vmem:[%s2931_s16] sm:$0xff] }
0x1239   :  { %1981 = vmatpush.msrb.mxu3 %v1955_v17 }
0x123a   :  { %v1899_v16 = vsel %vm63_vm0, %v1891_v43, 0.0 }
0x123b   :  { %1900 = vadd.xlane.f32.xlu2 %v1899_v16 }
0x1243   :  { %1909 = vadd.xlane.f32.xlu2 %v1908_v58 }
0x12ae   :  { %v1901_v57 = vpop.xlane.xlu2 %1900 }
0x12af   :  { %v1903_v59 = vmul.f32 %v1901_v57, %v2348_v8 }
0x12b1   :  { %v1905_v60 = vsub.f32 %v1891_v43, %v1903_v59 }
0x12b3   :  { %v1907_v32 = vmul.f32 %v1905_v60, %v1905_v60 }
0x12b5   :  { %v1911_v37 = vsel %vm63_vm0, %v1907_v32, 0.0 }
0x12b6   :  { %1912 = vadd.xlane.f32.xlu0 %v1911_v37  ;;  %v1910_v61 = vpop.xlane.xlu2 %1909 }
0x12b7   :  { %v1914_v36 = vmul.f32 %v1910_v61, %v2348_v8 }
0x12b9   :  { %v1916_v63 = vadd.f32 1e-05, %v1914_v36 }
0x12bb   :  { %2236 = vrsqrt.f32 %v1916_v63  ;;  %vm1924_vm10 = vweird.f32 %v1916_v63 }
0x12c1   :  { %v2237_v42 = vpop.eup %2236 }
0x12c2   :  { %v1919_v3 = vmul.f32 %v2237_v42, %v1916_v63  ;;  %vm1925_vm4 = vweird.f32 %v2237_v42 }
0x12c3   :  { %vm1926_vm11 = vmor %vm1924_vm10, %vm1925_vm4 }
0x12c4   :  { %v1920_v7 = vmul.f32 %v2237_v42, %v1919_v3 }
0x12c6   :  { %v1921_v49 = vmul.f32 0.5, %v1920_v7 }
0x12c8   :  { %v1922_v10 = vsub.f32 1.5, %v1921_v49 }
0x12ca   :  { %v1923_v11 = vmul.f32 %v2237_v42, %v1922_v10 }
0x12cc   :  { %v1927_v13 = vsel %vm1926_vm11, %v2237_v42, %v1923_v11 }
0x12cd   :  { %v1938_v34 = vmul.f32 %v1927_v13, %v1904_v55 }
0x1329   :  { %v1913_v5 = vpop.xlane.xlu0 %1912 }
0x132a   :  { %v1915_v6 = vmul.f32 %v1913_v5, %v2348_v8  ;;  %v2135_v8 = vld [vmem:[%s2928_s14 + $0x1] ss:$0 sm:$0xff] }
0x132b   :  { %v1943_v4 = vmul.f32 %v2135_v8, %v1938_v34 }
0x132c   :  { %v1917_v9 = vadd.f32 1e-05, %v1915_v6 }
0x132d   :  { %v1948_v22 = vadd.f32 %v2136_v20, %v1943_v4 }
0x132e   :  { %2238 = vrsqrt.f32 %v1917_v9  ;;  %vm1934_vm13 = vweird.f32 %v1917_v9 }
0x1334   :  { %v2239_v2 = vpop.eup %2238 }
0x1335   :  { %v1929_v38 = vmul.f32 %v2239_v2, %v1917_v9  ;;  %vm1935_vm12 = vweird.f32 %v2239_v2 }
0x1336   :  { %vm1936_vm14 = vmor %vm1934_vm13, %vm1935_vm12 }
0x1337   :  { %v1930_v62 = vmul.f32 %v2239_v2, %v1929_v38 }
0x1339   :  { %v1931_v12 = vmul.f32 0.5, %v1930_v62 }
0x133b   :  { %v1932_v15 = vsub.f32 1.5, %v1931_v12 }
0x133d   :  { %v1933_v14 = vmul.f32 %v2239_v2, %v1932_v15 }
0x133f   :  { %v1937_v18 = vsel %vm1936_vm14, %v2239_v2, %v1933_v14 }
0x1340   :  { %v1939_v19 = vmul.f32 %v1937_v18, %v1905_v60 }
0x1342   :  { %v1944_v1 = vmul.f32 %v2135_v8, %v1939_v19 }
0x1344   :  { %v1949_v21 = vadd.f32 %v2136_v20, %v1944_v1 }
0x1346   :  { %v1951_v23 = vrot.slane %v1949_v21, 7 }
0x1348   :  { %v1954_v24 = vsel %vm1953_vm15, %v1948_v22, %v1951_v23 }
0x1349   :  { %2085 = vmatmul.msk.f32.vlgmr.msrb.gmra.mxu3 %vm63_vm0, %v1954_v24 }
0x13cc   :  { %v1983_v26 = vpop.f32.mrf.mxu3 }
0x13cd   :  { %v1984_v27 = vadd.f32 %v2137_v25, %v1983_v26 }
0x13cf   :  { %1986 = vst [vmem:[%s2932_s18] sm:$0x3] %v1984_v27 }

</bundles_post_ra>
